<compile_context>
chip_gen: v6e
topology: v6e:2x2x1
jax: 0.10.0
libtpu: 0.0.40
codegen_flags: <defaults>
</compile_context>

<pallas_src>
import functools
import math

import jax
import jax.numpy as jnp
from jax.experimental import pallas as pl
from jax.experimental.pallas import tpu as pltpu

_DN = ("NHWC", "HWIO", "NHWC")


def _round_up(x, m):
    return ((x + m - 1) // m) * m


# ----------------------------------------------------------------------------
# Plain-JAX conv helpers (prepare-time / reference only; never in the hot path)
# ----------------------------------------------------------------------------
def _conv_apply(x_nhwc, w, stride):
    """VALID Conv2d, PyTorch weight layout (Cout, Cin, k, k), no bias."""
    return jax.lax.conv_general_dilated(
        x_nhwc, jnp.transpose(w, (2, 3, 1, 0)), (stride, stride), "VALID",
        dimension_numbers=_DN, precision=jax.lax.Precision.HIGHEST)


def _convt_apply(x_nhwc, w, stride, output_padding):
    """ConvTranspose2d, PyTorch weight layout (Cin, Cout, k, k), no bias."""
    k = w.shape[2]
    w_conv = jnp.transpose(jnp.flip(w, axis=(2, 3)), (1, 0, 2, 3))  # (Cout, Cin, k, k)
    return jax.lax.conv_general_dilated(
        x_nhwc, jnp.transpose(w_conv, (2, 3, 1, 0)), (1, 1),
        padding=[(k - 1, k - 1 + output_padding)] * 2, lhs_dilation=(stride, stride),
        dimension_numbers=_DN, precision=jax.lax.Precision.HIGHEST)


# ----------------------------------------------------------------------------
# One-time prepare: fold each layer into a dense GEMM operand
# ----------------------------------------------------------------------------
def _linearize(apply_fn, in_shape):
    """Exact dense matrix of a linear map R^{prod(in_shape)} -> R^{d_out}.

    Row i is apply_fn(e_i) flattened in NHWC order, computed at f32/HIGHEST so the
    entries are exactly the conv weights scattered into Toeplitz form.
    """
    d_in = math.prod(in_shape)
    basis = jnp.eye(d_in, dtype=jnp.float32).reshape((d_in,) + tuple(in_shape))
    out = apply_fn(basis)
    out_shape = tuple(out.shape[1:])
    return out.reshape(d_in, -1), out_shape


def prepare_bottleneck(params, hw=16):
    """Fold conv / transposed-conv layers into dense GEMM operands, once.

    Returns bf16 matrices of shape (P_in, P_out) (widths padded to multiples of
    128 lanes with zeros) and f32 per-output-element bias rows of shape (1, P_out).
    """
    # TODO(synk): the exact dense linearization is only sensible for tiny fixed
    # spatial sizes (16x16 here, ~1.5 MiB of matrices); at larger resolutions the
    # fused kernel should switch to an in-kernel im2col / col2im formulation.
    layer_specs = [
        (params[0], _conv_apply, dict(stride=2)),
        (params[1], _conv_apply, dict(stride=2)),
        (params[2], _conv_apply, dict(stride=1)),
        (params[3], _convt_apply, dict(stride=1, output_padding=0)),
        (params[4], _convt_apply, dict(stride=2, output_padding=0)),
        (params[5], _convt_apply, dict(stride=2, output_padding=1)),
    ]
    in_shape = (hw, hw, params[0][0].shape[1])
    first_shape = in_shape
    mats, biases = [], []
    for (w, b), fn, kw in layer_specs:
        mat, out_shape = _linearize(functools.partial(fn, w=w, **kw), in_shape)
        d_in, d_out = mat.shape
        bias_vec = jnp.tile(b, d_out // b.shape[0])        # NHWC flat: channel fastest
        p_in, p_out = _round_up(d_in, 128), _round_up(d_out, 128)
        mats.append(
            jnp.pad(mat, ((0, p_in - d_in), (0, p_out - d_out))).astype(jnp.bfloat16))
        biases.append(
            jnp.pad(bias_vec, (0, p_out - d_out)).reshape(1, p_out).astype(jnp.float32))
        in_shape = out_shape
    return {"mats": tuple(mats), "biases": tuple(biases),
            "in_shape": first_shape, "out_shape": in_shape}


# ----------------------------------------------------------------------------
# Fused Pallas kernel: 6 x (GEMM + bias + ReLU), everything resident on-chip
# ----------------------------------------------------------------------------
def _fused_autoencoder_kernel(x_ref, *refs):
    """h = relu(...relu(relu(x@M1+b1)@M2+b2)...@M6+b6).

    GEMM operands are bf16 (native MXU input on all generations); accumulation,
    bias-add and ReLU are f32.  Intermediate activations never touch HBM.
    """
    o_ref = refs[-1]
    h = x_ref[...]
    for idx in range(0, len(refs) - 1, 2):
        m_ref, b_ref = refs[idx], refs[idx + 1]
        z = jnp.dot(h.astype(jnp.bfloat16), m_ref[...],
                    preferred_element_type=jnp.float32)
        h = jnp.maximum(z + b_ref[...], 0.0)
    o_ref[...] = h


def bottleneck_v2_forward(prepared, x_nchw, *, row_block=256):
    mats, biases = prepared["mats"], prepared["biases"]
    hh, ww, cc = prepared["in_shape"]
    ho, wo, co = prepared["out_shape"]
    n = x_nchw.shape[0]
    d_in, d_out = hh * ww * cc, ho * wo * co
    p_in, p_out = mats[0].shape[0], mats[-1].shape[1]

    # NCHW -> NHWC -> (n, d_in); pad width to the 128-lane padded width (the extra
    # zero columns hit all-zero matrix rows, so results are unchanged).
    x_flat = jnp.transpose(x_nchw, (0, 2, 3, 1)).reshape(n, d_in)

    if n <= row_block:            # single grid step, full-batch block (no row padding)
        bm, n_pad = n, n
    else:                         # row blocks; "parallel" axis shards v7x's two TCs
        bm = row_block
        n_pad = _round_up(n, bm)
    x_flat = jnp.pad(x_flat, ((0, n_pad - n), (0, p_in - d_in)))

    in_specs = [pl.BlockSpec((bm, p_in), lambda i: (i, 0))]
    operands = [x_flat]
    for mat, bias in zip(mats, biases):
        in_specs.append(pl.BlockSpec(mat.shape, lambda i: (0, 0)))    # weights stay resident
        in_specs.append(pl.BlockSpec(bias.shape, lambda i: (0, 0)))
        operands.extend([mat, bias])

    out = pl.pallas_call(
        _fused_autoencoder_kernel,
        out_shape=jax.ShapeDtypeStruct((n_pad, p_out), jnp.float32),
        grid=(n_pad // bm,),
        in_specs=in_specs,
        out_specs=pl.BlockSpec((bm, p_out), lambda i: (i, 0)),
        compiler_params=pltpu.CompilerParams(dimension_semantics=("parallel",)),
    )(*operands)

    out = out[:n, :d_out].reshape(n, ho, wo, co)
    return jnp.transpose(out, (0, 3, 1, 2))          # NHWC -> NCHW


# ----------------------------------------------------------------------------
# Parameters (deterministic, PyTorch-like uniform fan-in init)
# ----------------------------------------------------------------------------
def init_params(key, input_channels=1, latent_dim=8):
    keys = jax.random.split(key, 12)

    def u(k, shape, fan_in):
        bound = 1.0 / jnp.sqrt(jnp.float32(fan_in))
        return jax.random.uniform(k, shape, jnp.float32, -bound, bound)

    params = []
    # encoder Conv2d layers: weight (Cout, Cin, 3, 3)
    enc = [(input_channels, 16), (16, 8), (8, latent_dim)]
    ki = 0
    for cin, cout in enc:
        fan_in = cin * 9
        params.append((u(keys[ki], (cout, cin, 3, 3), fan_in),
                       u(keys[ki + 1], (cout,), fan_in)))
        ki += 2
    # decoder ConvTranspose2d layers: weight (Cin, Cout, 3, 3)
    dec = [(latent_dim, 8), (8, 16), (16, input_channels)]
    for cin, cout in dec:
        fan_in = cout * 9
        params.append((u(keys[ki], (cin, cout, 3, 3), fan_in),
                       u(keys[ki + 1], (cout,), fan_in)))
        ki += 2
    return params


# ----------------------------------------------------------------------------
# References for correctness checking
# ----------------------------------------------------------------------------
def _ref_forward(params, x_nchw):
    """Pure-JAX f32 (HIGHEST precision) conv / conv-transpose reference."""
    (w1, b1), (w2, b2), (w3, b3), (w4, b4), (w5, b5), (w6, b6) = params
    x = jnp.transpose(x_nchw, (0, 2, 3, 1))
    x = jax.nn.relu(_conv_apply(x, w1, 2) + b1)
    x = jax.nn.relu(_conv_apply(x, w2, 2) + b2)
    x = jax.nn.relu(_conv_apply(x, w3, 1) + b3)
    x = jax.nn.relu(_convt_apply(x, w4, 1, 0) + b4)
    x = jax.nn.relu(_convt_apply(x, w5, 2, 0) + b5)
    x = jax.nn.relu(_convt_apply(x, w6, 2, 1) + b6)
    return jnp.transpose(x, (0, 3, 1, 2))


def _dense_ref(prepared, x_nchw):
    """Plain-JAX version of the exact math the Pallas kernel performs."""
    mats, biases = prepared["mats"], prepared["biases"]
    hh, ww, cc = prepared["in_shape"]
    ho, wo, co = prepared["out_shape"]
    n = x_nchw.shape[0]
    d_in, d_out = hh * ww * cc, ho * wo * co
    h = jnp.transpose(x_nchw, (0, 2, 3, 1)).reshape(n, d_in)
    h = jnp.pad(h, ((0, 0), (0, mats[0].shape[0] - d_in)))
    for m, b in zip(mats, biases):
        z = jnp.dot(h.astype(jnp.bfloat16), m, preferred_element_type=jnp.float32)
        h = jnp.maximum(z + b, 0.0)
    out = h[:, :d_out].reshape(n, ho, wo, co)
    return jnp.transpose(out, (0, 3, 1, 2))


if __name__ == "__main__":
    key = jax.random.PRNGKey(0)
    pkey, xkey = jax.random.split(key)
    params = init_params(pkey, input_channels=1, latent_dim=8)
    x = jax.random.normal(xkey, (2, 1, 16, 16), jnp.float32)   # NCHW like PyTorch

    prepared = prepare_bottleneck(params, hw=16)               # one-time weight folding

    fwd = jax.jit(functools.partial(bottleneck_v2_forward, prepared))
    y = jax.block_until_ready(fwd(x))
    assert y.shape == (2, 1, 16, 16), y.shape

    # 1) Tight check: Pallas kernel vs. identical bf16-operand GEMM chain in plain JAX.
    y_dense = jax.block_until_ready(_dense_ref(prepared, x))
    err_kernel = float(jnp.max(jnp.abs(y - y_dense)))
    assert err_kernel < 1e-3, f"kernel vs matched-math reference: {err_kernel}"

    # 2) Model-level check vs. f32 conv reference; tolerance reflects the bf16 MXU
    #    operand precision recommended by the performance review.
    y_ref = jax.block_until_ready(_ref_forward(params, x))
    err_model = float(jnp.max(jnp.abs(y - y_ref)))
    assert err_model < 5e-2, f"bf16 fused forward vs f32 conv reference: {err_model}"

    print("KERNEL_OK")
</pallas_src>

<mosaic_0001>
module attributes {stable_mosaic.version = 11 : i64} {
  func.func @_fused_autoencoder_kernel(%arg0: i32, %arg1: memref<2x256xf32, #tpu.memory_space<vmem>>, %arg2: memref<256x896xbf16, #tpu.memory_space<vmem>>, %arg3: memref<1x896xf32, #tpu.memory_space<vmem>>, %arg4: memref<896x128xbf16, #tpu.memory_space<vmem>>, %arg5: memref<1x128xf32, #tpu.memory_space<vmem>>, %arg6: memref<128x128xbf16, #tpu.memory_space<vmem>>, %arg7: memref<1x128xf32, #tpu.memory_space<vmem>>, %arg8: memref<128x128xbf16, #tpu.memory_space<vmem>>, %arg9: memref<1x128xf32, #tpu.memory_space<vmem>>, %arg10: memref<128x896xbf16, #tpu.memory_space<vmem>>, %arg11: memref<1x896xf32, #tpu.memory_space<vmem>>, %arg12: memref<896x256xbf16, #tpu.memory_space<vmem>>, %arg13: memref<1x256xf32, #tpu.memory_space<vmem>>, %arg14: memref<2x256xf32, #tpu.memory_space<vmem>>) attributes {dimension_semantics = [#tpu.dimension_semantics<parallel>], iteration_bounds = array<i64: 1>, scalar_prefetch = 0 : i64, scratch_operands = 0 : i64, tpu.core_type = #tpu.core_type<tc>, window_params = [{transform_indices = @transform_0, window_bounds = array<i64: 2, 256>}, {pipeline_mode = #tpu.pipeline_mode<synchronous>, transform_indices = @transform_1, window_bounds = array<i64: 256, 896>}, {pipeline_mode = #tpu.pipeline_mode<synchronous>, transform_indices = @transform_2, window_bounds = array<i64: 1, 896>}, {pipeline_mode = #tpu.pipeline_mode<synchronous>, transform_indices = @transform_3, window_bounds = array<i64: 896, 128>}, {pipeline_mode = #tpu.pipeline_mode<synchronous>, transform_indices = @transform_4, window_bounds = array<i64: 1, 128>}, {pipeline_mode = #tpu.pipeline_mode<synchronous>, transform_indices = @transform_5, window_bounds = array<i64: 128, 128>}, {pipeline_mode = #tpu.pipeline_mode<synchronous>, transform_indices = @transform_6, window_bounds = array<i64: 1, 128>}, {pipeline_mode = #tpu.pipeline_mode<synchronous>, transform_indices = @transform_7, window_bounds = array<i64: 128, 128>}, {pipeline_mode = #tpu.pipeline_mode<synchronous>, transform_indices = @transform_8, window_bounds = array<i64: 1, 128>}, {pipeline_mode = #tpu.pipeline_mode<synchronous>, transform_indices = @transform_9, window_bounds = array<i64: 128, 896>}, {pipeline_mode = #tpu.pipeline_mode<synchronous>, transform_indices = @transform_10, window_bounds = array<i64: 1, 896>}, {pipeline_mode = #tpu.pipeline_mode<synchronous>, transform_indices = @transform_11, window_bounds = array<i64: 896, 256>}, {pipeline_mode = #tpu.pipeline_mode<synchronous>, transform_indices = @transform_12, window_bounds = array<i64: 1, 256>}, {transform_indices = @transform_13, window_bounds = array<i64: 2, 256>}]} {
    %c0 = arith.constant 0 : index
    %c0_0 = arith.constant 0 : index
    %0 = vector.load %arg1[%c0, %c0_0] : memref<2x256xf32, #tpu.memory_space<vmem>>, vector<2x256xf32>
    %1 = arith.truncf %0 : vector<2x256xf32> to vector<2x256xbf16>
    %c0_1 = arith.constant 0 : index
    %c0_2 = arith.constant 0 : index
    %2 = vector.load %arg2[%c0_1, %c0_2] : memref<256x896xbf16, #tpu.memory_space<vmem>>, vector<256x896xbf16>
    %cst = arith.constant dense<0.000000e+00> : vector<2x896xf32>
    %3 = tpu.matmul %1, %2, %cst {dimension_numbers = #tpu.dot_dimension_numbers<[1], [0], [0], [1], [0, 0, 1, 1], [], []>} : vector<2x256xbf16>, vector<256x896xbf16>, vector<2x896xf32> -> vector<2x896xf32>
    %c0_3 = arith.constant 0 : index
    %c0_4 = arith.constant 0 : index
    %4 = vector.load %arg3[%c0_3, %c0_4] : memref<1x896xf32, #tpu.memory_space<vmem>>, vector<1x896xf32>
    %5 = vector.broadcast %4 : vector<1x896xf32> to vector<2x896xf32>
    %6 = arith.addf %3, %5 : vector<2x896xf32>
    %cst_5 = arith.constant 0.000000e+00 : f32
    %7 = vector.broadcast %cst_5 : f32 to vector<2x896xf32>
    %8 = arith.maximumf %6, %7 : vector<2x896xf32>
    %9 = arith.truncf %8 : vector<2x896xf32> to vector<2x896xbf16>
    %c0_6 = arith.constant 0 : index
    %c0_7 = arith.constant 0 : index
    %10 = vector.load %arg4[%c0_6, %c0_7] : memref<896x128xbf16, #tpu.memory_space<vmem>>, vector<896x128xbf16>
    %cst_8 = arith.constant dense<0.000000e+00> : vector<2x128xf32>
    %11 = tpu.matmul %9, %10, %cst_8 {dimension_numbers = #tpu.dot_dimension_numbers<[1], [0], [0], [1], [0, 0, 1, 1], [], []>} : vector<2x896xbf16>, vector<896x128xbf16>, vector<2x128xf32> -> vector<2x128xf32>
    %c0_9 = arith.constant 0 : index
    %c0_10 = arith.constant 0 : index
    %12 = vector.load %arg5[%c0_9, %c0_10] : memref<1x128xf32, #tpu.memory_space<vmem>>, vector<1x128xf32>
    %13 = vector.broadcast %12 : vector<1x128xf32> to vector<2x128xf32>
    %14 = arith.addf %11, %13 : vector<2x128xf32>
    %cst_11 = arith.constant 0.000000e+00 : f32
    %15 = vector.broadcast %cst_11 : f32 to vector<2x128xf32>
    %16 = arith.maximumf %14, %15 : vector<2x128xf32>
    %17 = arith.truncf %16 : vector<2x128xf32> to vector<2x128xbf16>
    %c0_12 = arith.constant 0 : index
    %c0_13 = arith.constant 0 : index
    %18 = vector.load %arg6[%c0_12, %c0_13] : memref<128x128xbf16, #tpu.memory_space<vmem>>, vector<128x128xbf16>
    %cst_14 = arith.constant dense<0.000000e+00> : vector<2x128xf32>
    %19 = tpu.matmul %17, %18, %cst_14 {dimension_numbers = #tpu.dot_dimension_numbers<[1], [0], [0], [1], [0, 0, 1, 1], [], []>} : vector<2x128xbf16>, vector<128x128xbf16>, vector<2x128xf32> -> vector<2x128xf32>
    %c0_15 = arith.constant 0 : index
    %c0_16 = arith.constant 0 : index
    %20 = vector.load %arg7[%c0_15, %c0_16] : memref<1x128xf32, #tpu.memory_space<vmem>>, vector<1x128xf32>
    %21 = vector.broadcast %20 : vector<1x128xf32> to vector<2x128xf32>
    %22 = arith.addf %19, %21 : vector<2x128xf32>
    %cst_17 = arith.constant 0.000000e+00 : f32
    %23 = vector.broadcast %cst_17 : f32 to vector<2x128xf32>
    %24 = arith.maximumf %22, %23 : vector<2x128xf32>
    %25 = arith.truncf %24 : vector<2x128xf32> to vector<2x128xbf16>
    %c0_18 = arith.constant 0 : index
    %c0_19 = arith.constant 0 : index
    %26 = vector.load %arg8[%c0_18, %c0_19] : memref<128x128xbf16, #tpu.memory_space<vmem>>, vector<128x128xbf16>
    %cst_20 = arith.constant dense<0.000000e+00> : vector<2x128xf32>
    %27 = tpu.matmul %25, %26, %cst_20 {dimension_numbers = #tpu.dot_dimension_numbers<[1], [0], [0], [1], [0, 0, 1, 1], [], []>} : vector<2x128xbf16>, vector<128x128xbf16>, vector<2x128xf32> -> vector<2x128xf32>
    %c0_21 = arith.constant 0 : index
    %c0_22 = arith.constant 0 : index
    %28 = vector.load %arg9[%c0_21, %c0_22] : memref<1x128xf32, #tpu.memory_space<vmem>>, vector<1x128xf32>
    %29 = vector.broadcast %28 : vector<1x128xf32> to vector<2x128xf32>
    %30 = arith.addf %27, %29 : vector<2x128xf32>
    %cst_23 = arith.constant 0.000000e+00 : f32
    %31 = vector.broadcast %cst_23 : f32 to vector<2x128xf32>
    %32 = arith.maximumf %30, %31 : vector<2x128xf32>
    %33 = arith.truncf %32 : vector<2x128xf32> to vector<2x128xbf16>
    %c0_24 = arith.constant 0 : index
    %c0_25 = arith.constant 0 : index
    %34 = vector.load %arg10[%c0_24, %c0_25] : memref<128x896xbf16, #tpu.memory_space<vmem>>, vector<128x896xbf16>
    %cst_26 = arith.constant dense<0.000000e+00> : vector<2x896xf32>
    %35 = tpu.matmul %33, %34, %cst_26 {dimension_numbers = #tpu.dot_dimension_numbers<[1], [0], [0], [1], [0, 0, 1, 1], [], []>} : vector<2x128xbf16>, vector<128x896xbf16>, vector<2x896xf32> -> vector<2x896xf32>
    %c0_27 = arith.constant 0 : index
    %c0_28 = arith.constant 0 : index
    %36 = vector.load %arg11[%c0_27, %c0_28] : memref<1x896xf32, #tpu.memory_space<vmem>>, vector<1x896xf32>
    %37 = vector.broadcast %36 : vector<1x896xf32> to vector<2x896xf32>
    %38 = arith.addf %35, %37 : vector<2x896xf32>
    %cst_29 = arith.constant 0.000000e+00 : f32
    %39 = vector.broadcast %cst_29 : f32 to vector<2x896xf32>
    %40 = arith.maximumf %38, %39 : vector<2x896xf32>
    %41 = arith.truncf %40 : vector<2x896xf32> to vector<2x896xbf16>
    %c0_30 = arith.constant 0 : index
    %c0_31 = arith.constant 0 : index
    %42 = vector.load %arg12[%c0_30, %c0_31] : memref<896x256xbf16, #tpu.memory_space<vmem>>, vector<896x256xbf16>
    %cst_32 = arith.constant dense<0.000000e+00> : vector<2x256xf32>
    %43 = tpu.matmul %41, %42, %cst_32 {dimension_numbers = #tpu.dot_dimension_numbers<[1], [0], [0], [1], [0, 0, 1, 1], [], []>} : vector<2x896xbf16>, vector<896x256xbf16>, vector<2x256xf32> -> vector<2x256xf32>
    %c0_33 = arith.constant 0 : index
    %c0_34 = arith.constant 0 : index
    %44 = vector.load %arg13[%c0_33, %c0_34] : memref<1x256xf32, #tpu.memory_space<vmem>>, vector<1x256xf32>
    %45 = vector.broadcast %44 : vector<1x256xf32> to vector<2x256xf32>
    %46 = arith.addf %43, %45 : vector<2x256xf32>
    %cst_35 = arith.constant 0.000000e+00 : f32
    %47 = vector.broadcast %cst_35 : f32 to vector<2x256xf32>
    %48 = arith.maximumf %46, %47 : vector<2x256xf32>
    %c0_36 = arith.constant 0 : index
    %c0_37 = arith.constant 0 : index
    %49 = vector.load %arg14[%c0_36, %c0_37] : memref<2x256xf32, #tpu.memory_space<vmem>>, vector<2x256xf32>
    tpu.vector_store %arg14[%c0_36, %c0_37], %48 {strides = array<i32>} : memref<2x256xf32, #tpu.memory_space<vmem>>, vector<2x256xf32>,
    return
  }
  func.func @transform_0(%arg0: i32) -> (i32, i32) {
    %c0_i32 = arith.constant 0 : i32
    %c0_i32_0 = arith.constant 0 : i32
    return %arg0, %c0_i32 : i32, i32
  }
  func.func @transform_1(%arg0: i32) -> (i32, i32) {
    %c0_i32 = arith.constant 0 : i32
    %c0_i32_0 = arith.constant 0 : i32
    %c0_i32_1 = arith.constant 0 : i32
    return %c0_i32, %c0_i32_0 : i32, i32
  }
  func.func @transform_2(%arg0: i32) -> (i32, i32) {
    %c0_i32 = arith.constant 0 : i32
    %c0_i32_0 = arith.constant 0 : i32
    %c0_i32_1 = arith.constant 0 : i32
    return %c0_i32, %c0_i32_0 : i32, i32
  }
  func.func @transform_3(%arg0: i32) -> (i32, i32) {
    %c0_i32 = arith.constant 0 : i32
    %c0_i32_0 = arith.constant 0 : i32
    %c0_i32_1 = arith.constant 0 : i32
    return %c0_i32, %c0_i32_0 : i32, i32
  }
  func.func @transform_4(%arg0: i32) -> (i32, i32) {
    %c0_i32 = arith.constant 0 : i32
    %c0_i32_0 = arith.constant 0 : i32
    %c0_i32_1 = arith.constant 0 : i32
    return %c0_i32, %c0_i32_0 : i32, i32
  }
  func.func @transform_5(%arg0: i32) -> (i32, i32) {
    %c0_i32 = arith.constant 0 : i32
    %c0_i32_0 = arith.constant 0 : i32
    %c0_i32_1 = arith.constant 0 : i32
    return %c0_i32, %c0_i32_0 : i32, i32
  }
  func.func @transform_6(%arg0: i32) -> (i32, i32) {
    %c0_i32 = arith.constant 0 : i32
    %c0_i32_0 = arith.constant 0 : i32
    %c0_i32_1 = arith.constant 0 : i32
    return %c0_i32, %c0_i32_0 : i32, i32
  }
  func.func @transform_7(%arg0: i32) -> (i32, i32) {
    %c0_i32 = arith.constant 0 : i32
    %c0_i32_0 = arith.constant 0 : i32
    %c0_i32_1 = arith.constant 0 : i32
    return %c0_i32, %c0_i32_0 : i32, i32
  }
  func.func @transform_8(%arg0: i32) -> (i32, i32) {
    %c0_i32 = arith.constant 0 : i32
    %c0_i32_0 = arith.constant 0 : i32
    %c0_i32_1 = arith.constant 0 : i32
    return %c0_i32, %c0_i32_0 : i32, i32
  }
  func.func @transform_9(%arg0: i32) -> (i32, i32) {
    %c0_i32 = arith.constant 0 : i32
    %c0_i32_0 = arith.constant 0 : i32
    %c0_i32_1 = arith.constant 0 : i32
    return %c0_i32, %c0_i32_0 : i32, i32
  }
  func.func @transform_10(%arg0: i32) -> (i32, i32) {
    %c0_i32 = arith.constant 0 : i32
    %c0_i32_0 = arith.constant 0 : i32
    %c0_i32_1 = arith.constant 0 : i32
    return %c0_i32, %c0_i32_0 : i32, i32
  }
  func.func @transform_11(%arg0: i32) -> (i32, i32) {
    %c0_i32 = arith.constant 0 : i32
    %c0_i32_0 = arith.constant 0 : i32
    %c0_i32_1 = arith.constant 0 : i32
    return %c0_i32, %c0_i32_0 : i32, i32
  }
  func.func @transform_12(%arg0: i32) -> (i32, i32) {
    %c0_i32 = arith.constant 0 : i32
    %c0_i32_0 = arith.constant 0 : i32
    %c0_i32_1 = arith.constant 0 : i32
    return %c0_i32, %c0_i32_0 : i32, i32
  }
  func.func @transform_13(%arg0: i32) -> (i32, i32) {
    %c0_i32 = arith.constant 0 : i32
    %c0_i32_0 = arith.constant 0 : i32
    return %arg0, %c0_i32 : i32, i32
  }
}

</mosaic_0001>

<bundles_post_ra>
// kernel: bottleneck_v2_forward.1
= control target key start
LH: loop header
LB: loop body
LE: loop exit
PB: predicated region body
PF: predicated region fallthrough
CT: control target
= control target key end

     0   :  { %18 = vsyncpa [#allocation3], 0  ;;  %s4771_s0 = inlined_call_operand.vmem [shape: f32[2,256], index: 0, kind: input, shape index: {}]   ;;  %s4772_s1 = inlined_call_operand.hbm [shape: bf16[256,896], index: 1, kind: input, shape index: {}]   ;;  %s4773_s2 = inlined_call_operand.vmem [shape: f32[1,896], index: 2, kind: input, shape index: {}]   ;;  %s4774_s3 = inlined_call_operand.hbm [shape: bf16[896,128], index: 3, kind: input, shape index: {}]   ;;  %s4775_s4 = inlined_call_operand.vmem [shape: f32[1,128], index: 4, kind: input, shape index: {}]   ;;  %s4776_s5 = inlined_call_operand.hbm [shape: bf16[128,128], index: 5, kind: input, shape index: {}]   ;;  %s4777_s6 = inlined_call_operand.vmem [shape: f32[1,128], index: 6, kind: input, shape index: {}]   ;;  %s4778_s7 = inlined_call_operand.hbm [shape: bf16[128,128], index: 7, kind: input, shape index: {}]   ;;  %s4779_s8 = inlined_call_operand.vmem [shape: f32[1,128], index: 8, kind: input, shape index: {}]   ;;  %s4780_s9 = inlined_call_operand.hbm [shape: bf16[128,896], index: 9, kind: input, shape index: {}]   ;;  %s4781_s10 = inlined_call_operand.vmem [shape: f32[1,896], index: 10, kind: input, shape index: {}]   ;;  %s4782_s11 = inlined_call_operand.hbm [shape: bf16[896,256], index: 11, kind: input, shape index: {}]   ;;  %s4783_s12 = inlined_call_operand.vmem [shape: f32[1,256], index: 12, kind: input, shape index: {}]   ;;  %s4784_s13 = inlined_call_operand.vmem [shape: f32[2,256], index: 13, kind: output, shape index: {}]  }
   0x1   :  { %19 = vsyncpa [#allocation5], 0 }
   0x2   :  { %20 = vsyncpa [#allocation8], 0 }
   0x3   :  { %21 = vsyncpa [#allocation11], 0  ;;  %s4522_s25 = smov [#allocation4]  }
   0x4   :  { %s43_s26 = sshll.u32 %s4522_s25, 4  ;;  %s44_s26 = int_to_ptr.vmem [resolvable:$true] %s43_s26 }
   0x5   :  { %s4402_s27 = scalar_lea.vmem %s44_s26, 7168  ;;  %p4407_p1 = scmp.lt.s32.totalorder %s44_s26, %s44_s26 }
   0x6   :  { %p4403_p0 = scmp.ne.s32.totalorder %s44_s26, %s4402_s27  ;;  %p4408_p2 = scmp.lt.s32.totalorder %s4402_s27, %s4402_s27 }
   0x8   :  { %p4409_p3 = por %p4408_p2, %p4407_p1 }
   0xa   :  { %p4410_p4 = pnand %p4409_p3, %p4403_p0 }
   0xc   :  { %4413 = shalt.err (!%p4410_p4)
}
   0xd   :  { %s4523_s28 = smov 64   ;;  %s4524_s29 = smov 4  }
   0xe   :  { %49 = dma.hbm_to_vmem [thread:$0]  %s4774_s3, 7168, %s44_s26, [#allocation5], %s4523_s28, %s4523_s28, %s4524_s29  }
   0xf   :  { %s4525_s15 = smov [#allocation7]   ;;  %s4526_s17 = smov [#allocation2]  }
  0x10   :  { %s71_s16 = sshll.u32 %s4525_s15, 4  ;;  %s29_s18 = sshll.u32 %s4526_s17, 4  ;;  %s72_s16 = int_to_ptr.vmem [resolvable:$true] %s71_s16  ;;  %s30_s18 = int_to_ptr.vmem [resolvable:$true] %s29_s18 }
  0x11   :  { %s4422_s19 = scalar_lea.vmem %s72_s16, 1024  ;;  %p4427_p6 = scmp.lt.s32.totalorder %s72_s16, %s72_s16 }
  0x12   :  { %p4423_p5 = scmp.ne.s32.totalorder %s72_s16, %s4422_s19  ;;  %p4428_p7 = scmp.lt.s32.totalorder %s4422_s19, %s4422_s19 }
  0x14   :  { %p4429_p8 = por %p4428_p7, %p4427_p6 }
  0x16   :  { %p4430_p9 = pnand %p4429_p8, %p4423_p5 }
  0x18   :  { %4433 = shalt.err (!%p4430_p9)
}
  0x19   :  { %77 = dma.hbm_to_vmem [thread:$0]  %s4778_s7, 1024, %s72_s16, [#allocation8], %s4523_s28, %s4523_s28, %s4524_s29  }
  0x1a   :  { %s4442_s3 = scalar_lea.vmem %s30_s18, 14336  ;;  %p4447_p11 = scmp.lt.s32.totalorder %s30_s18, %s30_s18 }
  0x1b   :  { %p4443_p10 = scmp.ne.s32.totalorder %s30_s18, %s4442_s3  ;;  %p4448_p12 = scmp.lt.s32.totalorder %s4442_s3, %s4442_s3 }
  0x1d   :  { %p4449_p13 = por %p4448_p12, %p4447_p11 }
  0x1f   :  { %p4450_p0 = pnand %p4449_p13, %p4443_p10 }
  0x21   :  { %4453 = shalt.err (!%p4450_p0)
}
  0x22   :  { %s4527_s22 = smov 448   ;;  %s4528_s23 = smov 28  }
  0x23   :  { %35 = dma.hbm_to_vmem [thread:$0]  %s4772_s1, 14336, %s30_s18, [#allocation3], %s4527_s22, %s4527_s22, %s4528_s23  }
  0x24   :  { %s4529_s26 = smov [#allocation6]   ;;  %s4530_s30 = smov [#allocation9]  }
  0x25   :  { %s57_s27 = sshll.u32 %s4529_s26, 4  ;;  %s85_s14 = sshll.u32 %s4530_s30, 4  ;;  %s58_s27 = int_to_ptr.vmem [resolvable:$true] %s57_s27  ;;  %s86_s14 = int_to_ptr.vmem [resolvable:$true] %s85_s14 }
  0x26   :  { %s4462_s7 = scalar_lea.vmem %s58_s27, 1024  ;;  %p4467_p2 = scmp.lt.s32.totalorder %s58_s27, %s58_s27 }
  0x27   :  { %p4463_p1 = scmp.ne.s32.totalorder %s58_s27, %s4462_s7  ;;  %p4468_p3 = scmp.lt.s32.totalorder %s4462_s7, %s4462_s7 }
  0x29   :  { %p4469_p4 = por %p4468_p3, %p4467_p2 }
  0x2b   :  { %p4470_p5 = pnand %p4469_p4, %p4463_p1 }
  0x2d   :  { %4473 = shalt.err (!%p4470_p5)
}
  0x2e   :  { %63 = dma.hbm_to_vmem [thread:$0]  %s4776_s5, 1024, %s58_s27, [#allocation5], %s4523_s28, %s4523_s28, %s4524_s29  }
  0x2f   :  { %s4482_s1 = scalar_lea.vmem %s86_s14, 7168  ;;  %p4487_p7 = scmp.lt.s32.totalorder %s86_s14, %s86_s14 }
  0x30   :  { %p4483_p6 = scmp.ne.s32.totalorder %s86_s14, %s4482_s1  ;;  %p4488_p8 = scmp.lt.s32.totalorder %s4482_s1, %s4482_s1 }
  0x32   :  { %p4489_p9 = por %p4488_p8, %p4487_p7 }
  0x34   :  { %p4490_p10 = pnand %p4489_p9, %p4483_p6 }
  0x36   :  { %4493 = shalt.err (!%p4490_p10)
}
  0x37   :  { %91 = dma.hbm_to_vmem [thread:$0]  %s4780_s9, 7168, %s86_s14, [#allocation8], %s4527_s22, %s4527_s22, %s4528_s23  }
  0x38   :  { %s4531_s19 = smov [#allocation10]  }
  0x39   :  { %s99_s20 = sshll.u32 %s4531_s19, 4  ;;  %s100_s20 = int_to_ptr.vmem [resolvable:$true] %s99_s20 }
  0x3a   :  { %s4502_s21 = scalar_lea.vmem %s100_s20, 14336  ;;  %p4507_p12 = scmp.lt.s32.totalorder %s100_s20, %s100_s20 }
  0x3b   :  { %p4503_p11 = scmp.ne.s32.totalorder %s100_s20, %s4502_s21  ;;  %p4508_p13 = scmp.lt.s32.totalorder %s4502_s21, %s4502_s21 }
  0x3d   :  { %p4509_p0 = por %p4508_p13, %p4507_p12 }
  0x3f   :  { %p4510_p1 = pnand %p4509_p0, %p4503_p11 }
  0x41   :  { %4513 = shalt.err (!%p4510_p1)
}
  0x42   :  { %s4532_s5 = smov 128   ;;  %s4533_s28 = smov 8  }
  0x43   :  { %105 = dma.hbm_to_vmem [thread:$0]  %s4782_s11, 14336, %s100_s20, [#allocation11], %s4532_s5, %s4532_s5, %s4533_s28  }
  0x44   :  { %4514 = dma.done.wait [#allocation3], 14336  }
  0x45   :  { %4515 = vsyncadd [#allocation3], 4294952960 }
  0x46   :  { %4516 = dma.done.wait [#allocation5], 8192  }
  0x47   :  { %4517 = vsyncadd [#allocation5], 4294959104 }
  0x48   :  { %4518 = dma.done.wait [#allocation8], 8192  }
  0x49   :  { %4519 = vsyncadd [#allocation8], 4294959104 }
  0x4a   :  { %4520 = dma.done.wait [#allocation11], 14336  }
  0x4b   :  { %4521 = vsyncadd [#allocation11], 4294952960  ;;  %v3914_v0 = vld [vmem:[#allocation2 + $0x18c] ss:$28 sps:$4 sm:$0xff]   ;;  %v3917_v2 = vld [vmem:[#allocation2 + $0x194] ss:$28 sps:$4 sm:$0xff]  }
  0x4c   :  { %v3916_v1 = vld [vmem:[#allocation2 + $0x188] ss:$28 sps:$4 sm:$0xff]   ;;  %882 = vmatprep.subr.bf16.mxu0 %v3914_v0  ;;  %v3919_v3 = vld [vmem:[#allocation2 + $0x190] ss:$28 sps:$4 sm:$0xff]   ;;  %923 = vmatprep.subr.bf16.mxu1 %v3917_v2  ;;  %v3923_v6 = vld [vmem:[#allocation2 + $0x15c] ss:$28 sps:$4 sm:$0xff]  }
  0x4d   :  { %883 = vmatpush1.bf16.msra.mxu0 %v3916_v1  ;;  %v3920_v4 = vld [vmem:[#allocation2 + $0x154] ss:$28 sps:$4 sm:$0xff]   ;;  %924 = vmatpush1.bf16.msra.mxu1 %v3919_v3  ;;  %v3926_v8 = vld [vmem:[#allocation2 + $0x11c] ss:$28 sps:$4 sm:$0xff]   ;;  %v3929_v10 = vld [vmem:[#allocation2 + $0x124] ss:$28 sps:$4 sm:$0xff]  }
  0x4e   :  { %v3922_v5 = vld [vmem:[#allocation2 + $0x150] ss:$28 sps:$4 sm:$0xff]   ;;  %884 = vmatprep.subr.bf16.mxu0 %v3920_v4  ;;  %v3925_v7 = vld [vmem:[#allocation2 + $0x158] ss:$28 sps:$4 sm:$0xff]   ;;  %925 = vmatprep.subr.bf16.mxu1 %v3923_v6  ;;  %v3932_v11 = vld [vmem:[#allocation2 + $0xe4] ss:$28 sps:$4 sm:$0xff]  }
  0x4f   :  { %v3928_v9 = vld [vmem:[#allocation2 + $0x118] ss:$28 sps:$4 sm:$0xff]   ;;  %v3931_v12 = vld [vmem:[#allocation2 + $0x120] ss:$28 sps:$4 sm:$0xff]   ;;  %v3935_v13 = vld [vmem:[#allocation2 + $0xec] ss:$28 sps:$4 sm:$0xff]  }
  0x50   :  { %v3934_v14 = vld [vmem:[#allocation2 + $0xe0] ss:$28 sps:$4 sm:$0xff]   ;;  %v3938_v15 = vld [vmem:[#allocation2 + $0xac] ss:$28 sps:$4 sm:$0xff]   ;;  %v3941_v17 = vld [vmem:[#allocation2 + $0xb4] ss:$28 sps:$4 sm:$0xff]  }
  0x51   :  { %885 = vmatpush1.bf16.msra.mxu0 %v3922_v5  ;;  %926 = vmatpush1.bf16.msra.mxu1 %v3925_v7  ;;  %v3937_v16 = vld [vmem:[#allocation2 + $0xe8] ss:$28 sps:$4 sm:$0xff]   ;;  %v3944_v19 = vld [vmem:[#allocation2 + $0x74] ss:$28 sps:$4 sm:$0xff]   ;;  %v3947_v21 = vld [vmem:[#allocation2 + $0x7c] ss:$28 sps:$4 sm:$0xff]  }
  0x52   :  { %886 = vmatprep.subr.bf16.mxu0 %v3926_v8  ;;  %927 = vmatprep.subr.bf16.mxu1 %v3929_v10  ;;  %v3940_v18 = vld [vmem:[#allocation2 + $0xa8] ss:$28 sps:$4 sm:$0xff]   ;;  %v3943_v20 = vld [vmem:[#allocation2 + $0xb0] ss:$28 sps:$4 sm:$0xff]   ;;  %v3950_v23 = vld [vmem:[#allocation2 + $0x3c] ss:$28 sps:$4 sm:$0xff]  }
  0x53   :  { %v3946_v22 = vld [vmem:[#allocation2 + $0x70] ss:$28 sps:$4 sm:$0xff]   ;;  %v3949_v24 = vld [vmem:[#allocation2 + $0x78] ss:$28 sps:$4 sm:$0xff]   ;;  %v3953_v25 = vld [vmem:[#allocation2 + $0x44] ss:$28 sps:$4 sm:$0xff]  }
  0x54   :  { %v3952_v26 = vld [vmem:[#allocation2 + $0x38] ss:$28 sps:$4 sm:$0xff]   ;;  %v3956_v27 = vld [vmem:[#allocation2 + $0x4] ss:$28 sps:$4 sm:$0xff]   ;;  %v3959_v29 = vld [vmem:[#allocation2 + $0xc] ss:$28 sps:$4 sm:$0xff]  }
  0x55   :  { %887 = vmatpush1.bf16.msra.mxu0 %v3928_v9  ;;  %928 = vmatpush1.bf16.msra.mxu1 %v3931_v12  ;;  %v3955_v28 = vld [vmem:[#allocation2 + $0x40] ss:$28 sps:$4 sm:$0xff]   ;;  %v3962_v31 = vld [vmem:[#allocation2 + $0x34c] ss:$28 sps:$4 sm:$0xff]   ;;  %v3965_v33 = vld [vmem:[#allocation2 + $0x354] ss:$28 sps:$4 sm:$0xff]  }
  0x56   :  { %888 = vmatprep.subr.bf16.mxu0 %v3932_v11  ;;  %929 = vmatprep.subr.bf16.mxu1 %v3935_v13  ;;  %v3958_v30 = vld [vmem:[#allocation2] ss:$28 sps:$4 sm:$0xff]   ;;  %v3961_v32 = vld [vmem:[#allocation2 + $0x8] ss:$28 sps:$4 sm:$0xff]   ;;  %v3968_v35 = vld [vmem:[#allocation2 + $0x314] ss:$28 sps:$4 sm:$0xff]  }
  0x57   :  { %v3964_v34 = vld [vmem:[#allocation2 + $0x348] ss:$28 sps:$4 sm:$0xff]   ;;  %v3967_v36 = vld [vmem:[#allocation2 + $0x350] ss:$28 sps:$4 sm:$0xff]   ;;  %v3971_v37 = vld [vmem:[#allocation2 + $0x31c] ss:$28 sps:$4 sm:$0xff]  }
  0x58   :  { %v3970_v38 = vld [vmem:[#allocation2 + $0x310] ss:$28 sps:$4 sm:$0xff]   ;;  %v3974_v39 = vld [vmem:[#allocation2 + $0x2dc] ss:$28 sps:$4 sm:$0xff]   ;;  %v3977_v41 = vld [vmem:[#allocation2 + $0x2e4] ss:$28 sps:$4 sm:$0xff]  }
  0x59   :  { %889 = vmatpush1.bf16.msra.mxu0 %v3934_v14  ;;  %930 = vmatpush1.bf16.msra.mxu1 %v3937_v16  ;;  %v3973_v40 = vld [vmem:[#allocation2 + $0x318] ss:$28 sps:$4 sm:$0xff]   ;;  %v3980_v43 = vld [vmem:[#allocation2 + $0x2a4] ss:$28 sps:$4 sm:$0xff]   ;;  %v3983_v45 = vld [vmem:[#allocation2 + $0x2ac] ss:$28 sps:$4 sm:$0xff]  }
  0x5a   :  { %890 = vmatprep.subr.bf16.mxu0 %v3938_v15  ;;  %931 = vmatprep.subr.bf16.mxu1 %v3941_v17  ;;  %v3976_v42 = vld [vmem:[#allocation2 + $0x2d8] ss:$28 sps:$4 sm:$0xff]   ;;  %v3979_v44 = vld [vmem:[#allocation2 + $0x2e0] ss:$28 sps:$4 sm:$0xff]   ;;  %v3986_v49 = vld [vmem:[#allocation2 + $0x26c] ss:$28 sps:$4 sm:$0xff]  }
  0x5b   :  { %v3338_v46 = vld.sshfl [vmem:[%s4771_s0] sm:$0x33 pattern:$0x76325410]  ;;  %v3985_v50 = vld [vmem:[#allocation2 + $0x2a8] ss:$28 sps:$4 sm:$0xff]  }
  0x5c   :  { %v3982_v47 = vld [vmem:[#allocation2 + $0x2a0] ss:$28 sps:$4 sm:$0xff]   ;;  %v136_v48 = vcombine.high %v3338_v46, %v3338_v46  ;;  %v3989_v52 = vld [vmem:[#allocation2 + $0x274] ss:$28 sps:$4 sm:$0xff]   ;;  %v3988_v53 = vld [vmem:[#allocation2 + $0x268] ss:$28 sps:$4 sm:$0xff]   ;;  %v4637_v4 = vpack.c.bf16 %v3338_v46, %v3338_v46 }
  0x5d   :  { %891 = vmatpush1.bf16.msra.mxu0 %v3940_v18  ;;  %932 = vmatpush1.bf16.msra.mxu1 %v3943_v20  ;;  %v3992_v54 = vld [vmem:[#allocation2 + $0x234] ss:$28 sps:$4 sm:$0xff]   ;;  %v3995_v56 = vld [vmem:[#allocation2 + $0x23c] ss:$28 sps:$4 sm:$0xff]   ;;  %v4001_v60 = vld [vmem:[#allocation2 + $0x204] ss:$28 sps:$4 sm:$0xff]  }
  0x5e   :  { %892 = vmatprep.subr.bf16.mxu0 %v3944_v19  ;;  %933 = vmatprep.subr.bf16.mxu1 %v3947_v21  ;;  %v140_v51 = vpack.c.bf16 %v136_v48, %v136_v48  ;;  %v3991_v55 = vld [vmem:[#allocation2 + $0x270] ss:$28 sps:$4 sm:$0xff]   ;;  %v3998_v58 = vld [vmem:[#allocation2 + $0x1fc] ss:$28 sps:$4 sm:$0xff]   ;;  %v4004_v62 = vld [vmem:[#allocation2 + $0x1c4] ss:$28 sps:$4 sm:$0xff]  }
  0x5f   :  { %v3994_v57 = vld [vmem:[#allocation2 + $0x230] ss:$28 sps:$4 sm:$0xff]   ;;  %v3997_v59 = vld [vmem:[#allocation2 + $0x238] ss:$28 sps:$4 sm:$0xff]   ;;  %v4003_v63 = vld [vmem:[#allocation2 + $0x200] ss:$28 sps:$4 sm:$0xff]  }
  0x60   :  { %914 = vmatprep.mubr.bf16.mxu0 %v140_v51  ;;  %955 = vmatprep.mubr.bf16.mxu1 %v140_v51  ;;  %v4000_v61 = vld [vmem:[#allocation2 + $0x1f8] ss:$28 sps:$4 sm:$0xff]   ;;  %v4007_v0 = vld [vmem:[#allocation2 + $0x1cc] ss:$28 sps:$4 sm:$0xff]   ;;  %v4006_v1 = vld [vmem:[#allocation2 + $0x1c0] ss:$28 sps:$4 sm:$0xff]  }
  0x61   :  { %893 = vmatpush1.bf16.msra.mxu0 %v3946_v22  ;;  %934 = vmatpush1.bf16.msra.mxu1 %v3949_v24  ;;  %v4012_v2 = vld [vmem:[#allocation2 + $0x19c] ss:$28 sps:$4 sm:$0xff]   ;;  %v4009_v3 = vld [vmem:[#allocation2 + $0x1c8] ss:$28 sps:$4 sm:$0xff]   ;;  %v4044_v13 = vld [vmem:[#allocation2 + $0x2f0] ss:$28 sps:$4 sm:$0xff]  }
  0x62   :  { %894 = vmatprep.subr.bf16.mxu0 %v3950_v23  ;;  %935 = vmatprep.subr.bf16.mxu1 %v3953_v25  ;;  %v4034_v5 = vld [vmem:[#allocation2 + $0x360] ss:$28 sps:$4 sm:$0xff]   ;;  %v4010_v6 = vld [vmem:[#allocation2 + $0x198] ss:$28 sps:$4 sm:$0xff]   ;;  %v4039_v9 = vld [vmem:[#allocation2 + $0x328] ss:$28 sps:$4 sm:$0xff]  }
  0x63   :  { %v4015_v7 = vld [vmem:[#allocation2 + $0x164] ss:$28 sps:$4 sm:$0xff]   ;;  %v4018_v11 = vld [vmem:[#allocation2 + $0x12c] ss:$28 sps:$4 sm:$0xff]   ;;  %v4021_v15 = vld [vmem:[#allocation2 + $0xf4] ss:$28 sps:$4 sm:$0xff]  }
  0x64   :  { %v4035_v8 = vld [vmem:[#allocation2 + $0x1a0] ss:$28 sps:$4 sm:$0xff]   ;;  %v4040_v12 = vld [vmem:[#allocation2 + $0x168] ss:$28 sps:$4 sm:$0xff]   ;;  %v4045_v16 = vld [vmem:[#allocation2 + $0x130] ss:$28 sps:$4 sm:$0xff]  }
  0x65   :  { %895 = vmatpush1.bf16.msra.mxu0 %v3952_v26  ;;  %936 = vmatpush1.bf16.msra.mxu1 %v3955_v28  ;;  %v4013_v10 = vld [vmem:[#allocation2 + $0x160] ss:$28 sps:$4 sm:$0xff]   ;;  %v4016_v14 = vld [vmem:[#allocation2 + $0x128] ss:$28 sps:$4 sm:$0xff]   ;;  %v4049_v17 = vld [vmem:[#allocation2 + $0x2b8] ss:$28 sps:$4 sm:$0xff]  }
  0x66   :  { %896 = vmatprep.subr.bf16.mxu0 %v3956_v27  ;;  %937 = vmatprep.subr.bf16.mxu1 %v3959_v29  ;;  %v4019_v18 = vld [vmem:[#allocation2 + $0xf0] ss:$28 sps:$4 sm:$0xff]   ;;  %v4024_v19 = vld [vmem:[#allocation2 + $0xbc] ss:$28 sps:$4 sm:$0xff]   ;;  %v4027_v23 = vld [vmem:[#allocation2 + $0x84] ss:$28 sps:$4 sm:$0xff]  }
  0x67   :  { %v4050_v20 = vld [vmem:[#allocation2 + $0xf8] ss:$28 sps:$4 sm:$0xff]   ;;  %v4054_v21 = vld [vmem:[#allocation2 + $0x280] ss:$28 sps:$4 sm:$0xff]   ;;  %v4059_v25 = vld [vmem:[#allocation2 + $0x248] ss:$28 sps:$4 sm:$0xff]  }
  0x68   :  { %v4022_v22 = vld [vmem:[#allocation2 + $0xb8] ss:$28 sps:$4 sm:$0xff]   ;;  %v4055_v24 = vld [vmem:[#allocation2 + $0xc0] ss:$28 sps:$4 sm:$0xff]   ;;  %v4030_v27 = vld [vmem:[#allocation2 + $0x4c] ss:$28 sps:$4 sm:$0xff]  }
  0x69   :  { %897 = vmatpush1.bf16.msra.mxu0 %v3958_v30  ;;  %938 = vmatpush1.bf16.msra.mxu1 %v3961_v32  ;;  %v4025_v26 = vld [vmem:[#allocation2 + $0x80] ss:$28 sps:$4 sm:$0xff]   ;;  %v4060_v28 = vld [vmem:[#allocation2 + $0x88] ss:$28 sps:$4 sm:$0xff]   ;;  %v4064_v29 = vld [vmem:[#allocation2 + $0x210] ss:$28 sps:$4 sm:$0xff]  }
  0x6a   :  { %898 = vmatprep.subr.bf16.mxu0 %v3962_v31  ;;  %939 = vmatprep.subr.bf16.mxu1 %v3965_v33  ;;  %v4028_v30 = vld [vmem:[#allocation2 + $0x48] ss:$28 sps:$4 sm:$0xff]   ;;  %v4033_v31 = vld [vmem:[#allocation2 + $0x14] ss:$28 sps:$4 sm:$0xff]   ;;  %vm4535_vm0 = vmmov 0  }
  0x6b   :  { %v4065_v32 = vld [vmem:[#allocation2 + $0x50] ss:$28 sps:$4 sm:$0xff]   ;;  %v4069_v33 = vld [vmem:[#allocation2 + $0x1d8] ss:$28 sps:$4 sm:$0xff]  }
  0x6c   :  { %v4053_v46 = vld [vmem:[#allocation2 + $0x2b4] ss:$28 sps:$4 sm:$0xff]   ;;  %v4083_v48 = vld [vmem:[#allocation4 + $0x28] sm:$0xff]  }
  0x6d   :  { %899 = vmatpush2.bf16.msra.mxu0 %v3964_v34  ;;  %940 = vmatpush2.bf16.msra.mxu1 %v3967_v36  ;;  %v4031_v34 = vld [vmem:[#allocation2 + $0x10] ss:$28 sps:$4 sm:$0xff]   ;;  %v4070_v36 = vld [vmem:[#allocation2 + $0x18] ss:$28 sps:$4 sm:$0xff]  }
  0x6e   :  { %900 = vmatprep.subr.bf16.mxu0 %v3968_v35  ;;  %941 = vmatprep.subr.bf16.mxu1 %v3971_v37  ;;  %v4038_v35 = vld [vmem:[#allocation2 + $0x35c] ss:$28 sps:$4 sm:$0xff]  }
  0x6f   :  { %v4074_v37 = vld [vmem:[#allocation4 + $0x78] sm:$0xff]  }
  0x71   :  { %901 = vmatpush2.bf16.msra.mxu0 %v3970_v38  ;;  %942 = vmatpush2.bf16.msra.mxu1 %v3973_v40  ;;  %v4036_v38 = vld [vmem:[#allocation2 + $0x358] ss:$28 sps:$4 sm:$0xff]  }
  0x72   :  { %902 = vmatprep.subr.bf16.mxu0 %v3974_v39  ;;  %943 = vmatprep.subr.bf16.mxu1 %v3977_v41  ;;  %v4043_v39 = vld [vmem:[#allocation2 + $0x324] ss:$28 sps:$4 sm:$0xff]   ;;  %v4075_v40 = vld [vmem:[#allocation4 + $0x38] sm:$0xff]   ;;  %v4078_v41 = vld [vmem:[#allocation4 + $0x70] sm:$0xff]  }
  0x75   :  { %903 = vmatpush2.bf16.msra.mxu0 %v3976_v42  ;;  %944 = vmatpush2.bf16.msra.mxu1 %v3979_v44  ;;  %v4041_v42 = vld [vmem:[#allocation2 + $0x320] ss:$28 sps:$4 sm:$0xff]   ;;  %v4046_v44 = vld [vmem:[#allocation2 + $0x2e8] ss:$28 sps:$4 sm:$0xff]  }
  0x76   :  { %904 = vmatprep.subr.bf16.mxu0 %v3980_v43  ;;  %945 = vmatprep.subr.bf16.mxu1 %v3983_v45  ;;  %v4048_v43 = vld [vmem:[#allocation2 + $0x2ec] ss:$28 sps:$4 sm:$0xff]   ;;  %v4079_v45 = vld [vmem:[#allocation4 + $0x30] sm:$0xff]  }
  0x79   :  { %905 = vmatpush2.bf16.msra.mxu0 %v3982_v47  ;;  %946 = vmatpush2.bf16.msra.mxu1 %v3985_v50  ;;  %v4082_v47 = vld [vmem:[#allocation4 + $0x68] sm:$0xff]  }
  0x7a   :  { %906 = vmatprep.subr.bf16.mxu0 %v3986_v49  ;;  %947 = vmatprep.subr.bf16.mxu1 %v3989_v52  ;;  %v4086_v49 = vld [vmem:[#allocation4 + $0x60] sm:$0xff]   ;;  %v4051_v50 = vld [vmem:[#allocation2 + $0x2b0] ss:$28 sps:$4 sm:$0xff]  }
  0x7b   :  { %v4087_v52 = vld [vmem:[#allocation4 + $0x20] sm:$0xff]  }
  0x7d   :  { %907 = vmatpush2.bf16.msra.mxu0 %v3988_v53  ;;  %948 = vmatpush2.bf16.msra.mxu1 %v3991_v55  ;;  %v4090_v53 = vld [vmem:[#allocation4 + $0x58] sm:$0xff]   ;;  %v4063_v55 = vld [vmem:[#allocation2 + $0x244] ss:$28 sps:$4 sm:$0xff]  }
  0x7e   :  { %908 = vmatprep.subr.bf16.mxu0 %v3992_v54  ;;  %949 = vmatprep.subr.bf16.mxu1 %v3995_v56  ;;  %v4056_v54 = vld [vmem:[#allocation2 + $0x278] ss:$28 sps:$4 sm:$0xff]  }
  0x7f   :  { %v4091_v56 = vld [vmem:[#allocation4 + $0x18] sm:$0xff]  }
  0x81   :  { %909 = vmatpush2.bf16.msra.mxu0 %v3994_v57  ;;  %950 = vmatpush2.bf16.msra.mxu1 %v3997_v59  ;;  %v4094_v57 = vld [vmem:[#allocation4 + $0x50] sm:$0xff]   ;;  %v4068_v59 = vld [vmem:[#allocation2 + $0x20c] ss:$28 sps:$4 sm:$0xff]  }
  0x82   :  { %910 = vmatprep.subr.bf16.mxu0 %v3998_v58  ;;  %951 = vmatprep.subr.bf16.mxu1 %v4001_v60  ;;  %v4061_v58 = vld [vmem:[#allocation2 + $0x240] ss:$28 sps:$4 sm:$0xff]   ;;  %v4095_v60 = vld [vmem:[#allocation4 + $0x10] sm:$0xff]  }
  0x85   :  { %911 = vmatpush2.bf16.msra.mxu0 %v4000_v61  ;;  %952 = vmatpush2.bf16.msra.mxu1 %v4003_v63  ;;  %v4066_v61 = vld [vmem:[#allocation2 + $0x208] ss:$28 sps:$4 sm:$0xff]   ;;  %v4071_v63 = vld [vmem:[#allocation2 + $0x1d0] ss:$28 sps:$4 sm:$0xff]  }
  0x86   :  { %912 = vmatprep.subr.bf16.mxu0 %v4004_v62  ;;  %953 = vmatprep.subr.bf16.mxu1 %v4007_v0  ;;  %v4073_v62 = vld [vmem:[#allocation2 + $0x1d4] ss:$28 sps:$4 sm:$0xff]   ;;  %v4076_v0 = vld [vmem:[#allocation4 + $0xf8] sm:$0xff]  }
  0x89   :  { %913 = vmatpush2.bf16.msra.mxu0 %v4006_v1  ;;  %954 = vmatpush2.bf16.msra.mxu1 %v4009_v3  ;;  %v4077_v1 = vld [vmem:[#allocation4 + $0xb8] sm:$0xff]   ;;  %v4081_v3 = vld [vmem:[#allocation4 + $0xb0] sm:$0xff]  }
  0x8a   :  { %964 = vmatprep.subr.bf16.mxu0 %v4012_v2  ;;  %3695 = vmatprep.subr.bf16.mxu1 %v4034_v5  ;;  %v4080_v2 = vld [vmem:[#allocation4 + $0xf0] sm:$0xff]   ;;  %v4098_v5 = vld [vmem:[#allocation4 + $0x48] sm:$0xff]  }
  0x8c   :  { %915 = vmatmul.mubr.bf16.vlgmr.msra.gmra.mxu0 %v4637_v4  ;;  %956 = vmatmul.mubr.bf16.vlgmr.msra.gmra.mxu1 %v4637_v4 }
  0x8d   :  { %965 = vmatpush1.bf16.msra.mxu0 %v4010_v6  ;;  %996 = vmatprep.mubr.bf16.mxu0 %v140_v51  ;;  %v4099_v6 = vld [vmem:[#allocation4 + $0x8] sm:$0xff]  }
  0x8e   :  { %966 = vmatprep.subr.bf16.mxu0 %v4015_v7  ;;  %3696 = vmatpush3.bf16.msra.mxu1 %v4035_v8  ;;  %v4084_v7 = vld [vmem:[#allocation4 + $0xe8] sm:$0xff]  }
  0x8f   :  { %1037 = vmatprep.mubr.bf16.mxu1 %v140_v51  ;;  %3697 = vmatprep.subr.bf16.mxu1 %v4039_v9  ;;  %v4058_v51 = vld [vmem:[#allocation2 + $0x27c] ss:$28 sps:$4 sm:$0xff]   ;;  %v4085_v8 = vld [vmem:[#allocation4 + $0xa8] sm:$0xff]   ;;  %v4102_v9 = vld [vmem:[#allocation4 + $0x40] sm:$0xff]  }
  0x91   :  { %967 = vmatpush1.bf16.msra.mxu0 %v4013_v10  ;;  %v4103_v10 = vld [vmem:[#allocation4] sm:$0xff]  }
  0x92   :  { %968 = vmatprep.subr.bf16.mxu0 %v4018_v11  ;;  %3698 = vmatpush3.bf16.msra.mxu1 %v4040_v12  ;;  %v4088_v11 = vld [vmem:[#allocation4 + $0xe0] sm:$0xff]  }
  0x93   :  { %3699 = vmatprep.subr.bf16.mxu1 %v4044_v13  ;;  %v4089_v12 = vld [vmem:[#allocation4 + $0xa0] sm:$0xff]   ;;  %v4092_v13 = vld [vmem:[#allocation4 + $0xd8] sm:$0xff]  }
  0x95   :  { %969 = vmatpush1.bf16.msra.mxu0 %v4016_v14  ;;  %v4107_v14 = vld [vmem:[#allocation4 + $0x178] sm:$0xff]  }
  0x96   :  { %970 = vmatprep.subr.bf16.mxu0 %v4021_v15  ;;  %3700 = vmatpush3.bf16.msra.mxu1 %v4045_v16  ;;  %v4096_v15 = vld [vmem:[#allocation4 + $0xd0] sm:$0xff]  }
  0x97   :  { %3701 = vmatprep.subr.bf16.mxu1 %v4049_v17  ;;  %v4097_v16 = vld [vmem:[#allocation4 + $0x90] sm:$0xff]   ;;  %v4100_v17 = vld [vmem:[#allocation4 + $0xc8] sm:$0xff]  }
  0x99   :  { %971 = vmatpush1.bf16.msra.mxu0 %v4019_v18  ;;  %v4101_v18 = vld [vmem:[#allocation4 + $0x88] sm:$0xff]  }
  0x9a   :  { %972 = vmatprep.subr.bf16.mxu0 %v4024_v19  ;;  %3702 = vmatpush3.bf16.msra.mxu1 %v4050_v20  ;;  %v4104_v19 = vld [vmem:[#allocation4 + $0xc0] sm:$0xff]  }
  0x9b   :  { %3703 = vmatprep.subr.bf16.mxu1 %v4054_v21  ;;  %v4105_v20 = vld [vmem:[#allocation4 + $0x80] sm:$0xff]   ;;  %v4534_v21 = vmov 0.0  }
  0x9d   :  { %973 = vmatpush1.bf16.msra.mxu0 %v4022_v22  ;;  %v271_v22 = vlaneseq }
  0x9e   :  { %974 = vmatprep.subr.bf16.mxu0 %v4027_v23  ;;  %3704 = vmatpush3.bf16.msra.mxu1 %v4055_v24 }
  0x9f   :  { %3705 = vmatprep.subr.bf16.mxu1 %v4059_v25  ;;  %v4644_v23 = vshrl.u32 %v271_v22, 7  ;;  %v4652_v25 = vld [vmem:[%s4773_s2] sm:$0xff] }
  0xa1   :  { %975 = vmatpush1.bf16.msra.mxu0 %v4025_v26  ;;  %v4647_v24 = vsub.s32 0, %v4644_v23  ;;  %v4655_v26 = vsub.s32 1, %v4644_v23 }
  0xa2   :  { %976 = vmatprep.subr.bf16.mxu0 %v4030_v27  ;;  %3706 = vmatpush3.bf16.msra.mxu1 %v4060_v28  ;;  %v281_v27 = vsub.s32 2, %v4644_v23 }
  0xa3   :  { %3707 = vmatprep.subr.bf16.mxu1 %v4064_v29  ;;  %v274_v28 = vrot.slane %v4652_v25, %v4647_v24  ;;  %v285_v29 = vsub.s32 3, %v4644_v23 }
  0xa5   :  { %977 = vmatpush1.bf16.msra.mxu0 %v4028_v30  ;;  %v278_v30 = vrot.slane %v4652_v25, %v4655_v26 }
  0xa6   :  { %978 = vmatprep.subr.bf16.mxu0 %v4033_v31  ;;  %3708 = vmatpush3.bf16.msra.mxu1 %v4065_v32  ;;  %v282_v31 = vrot.slane %v4652_v25, %v281_v27 }
  0xa7   :  { %3709 = vmatprep.subr.bf16.mxu1 %v4069_v33 }
  0xa9   :  { %979 = vmatpush1.bf16.msra.mxu0 %v4031_v34  ;;  %v286_v34 = vrot.slane %v4652_v25, %v285_v29 }
  0xaa   :  { %980 = vmatprep.subr.bf16.mxu0 %v4038_v35  ;;  %3710 = vmatpush3.bf16.msra.mxu1 %v4070_v36 }
  0xab   :  { %3717 = vmatprep.subr.bf16.mxu1 %v4074_v37 }
  0xad   :  { %981 = vmatpush2.bf16.msra.mxu0 %v4036_v38  ;;  %1038 = vmatmul.mubr.bf16.vlgmr.msra.gmra.mxu1 %v4637_v4 }
  0xae   :  { %982 = vmatprep.subr.bf16.mxu0 %v4043_v39  ;;  %3718 = vmatpush3.bf16.msra.mxu1 %v4075_v40 }
  0xaf   :  { %3719 = vmatprep.subr.bf16.mxu1 %v4078_v41 }
  0xb1   :  { %983 = vmatpush2.bf16.msra.mxu0 %v4041_v42 }
  0xb2   :  { %984 = vmatprep.subr.bf16.mxu0 %v4048_v43  ;;  %3720 = vmatpush3.bf16.msra.mxu1 %v4079_v45 }
  0xb3   :  { %3721 = vmatprep.subr.bf16.mxu1 %v4082_v47 }
  0xb5   :  { %985 = vmatpush2.bf16.msra.mxu0 %v4046_v44 }
  0xb6   :  { %986 = vmatprep.subr.bf16.mxu0 %v4053_v46  ;;  %3722 = vmatpush3.bf16.msra.mxu1 %v4083_v48 }
  0xb7   :  { %3723 = vmatprep.subr.bf16.mxu1 %v4086_v49  ;;  %v4108_v49 = vld [vmem:[#allocation4 + $0x138] sm:$0xff]  }
  0xb9   :  { %987 = vmatpush2.bf16.msra.mxu0 %v4051_v50 }
  0xba   :  { %988 = vmatprep.subr.bf16.mxu0 %v4058_v51  ;;  %3724 = vmatpush3.bf16.msra.mxu1 %v4087_v52 }
  0xbb   :  { %3725 = vmatprep.subr.bf16.mxu1 %v4090_v53  ;;  %v4110_v53 = vld [vmem:[#allocation4 + $0x170] sm:$0xff]  }
  0xbd   :  { %989 = vmatpush2.bf16.msra.mxu0 %v4056_v54 }
  0xbe   :  { %990 = vmatprep.subr.bf16.mxu0 %v4063_v55  ;;  %3726 = vmatpush3.bf16.msra.mxu1 %v4091_v56  ;;  %v4106_v55 = vld [vmem:[#allocation4 + $0x1b8] sm:$0xff]   ;;  %v4111_v56 = vld [vmem:[#allocation4 + $0x130] sm:$0xff]  }
  0xbf   :  { %3727 = vmatprep.subr.bf16.mxu1 %v4094_v57  ;;  %v4113_v57 = vld [vmem:[#allocation4 + $0x168] sm:$0xff]  }
  0xc1   :  { %991 = vmatpush2.bf16.msra.mxu0 %v4061_v58  ;;  %v4109_v58 = vld [vmem:[#allocation4 + $0x1b0] sm:$0xff]  }
  0xc2   :  { %992 = vmatprep.subr.bf16.mxu0 %v4068_v59  ;;  %3728 = vmatpush3.bf16.msra.mxu1 %v4095_v60  ;;  %v4114_v59 = vld [vmem:[#allocation4 + $0x128] sm:$0xff]   ;;  %v4116_v60 = vld [vmem:[#allocation4 + $0x160] sm:$0xff]  }
  0xc3   :  { %3729 = vmatprep.subr.bf16.mxu1 %v4098_v5  ;;  %v4123_v5 = vld [vmem:[#allocation4 + $0x110] sm:$0xff]  }
  0xc5   :  { %993 = vmatpush2.bf16.msra.mxu0 %v4066_v61  ;;  %v4112_v61 = vld [vmem:[#allocation4 + $0x1a8] sm:$0xff]  }
  0xc6   :  { %994 = vmatprep.subr.bf16.mxu0 %v4073_v62  ;;  %3730 = vmatpush3.bf16.msra.mxu1 %v4099_v6  ;;  %v4117_v62 = vld [vmem:[#allocation4 + $0x120] sm:$0xff]   ;;  %v4125_v6 = vld [vmem:[#allocation4 + $0x148] sm:$0xff]  }
  0xc7   :  { %3731 = vmatprep.subr.bf16.mxu1 %v4102_v9  ;;  %v4126_v9 = vld [vmem:[#allocation4 + $0x108] sm:$0xff]  }
  0xc9   :  { %995 = vmatpush2.bf16.msra.mxu0 %v4071_v63  ;;  %v4119_v63 = vld [vmem:[#allocation4 + $0x158] sm:$0xff]  }
  0xca   :  { %3739 = vmatprep.subr.bf16.mxu0 %v4076_v0  ;;  %3732 = vmatpush3.bf16.msra.mxu1 %v4103_v10  ;;  %v4115_v0 = vld [vmem:[#allocation4 + $0x1a0] sm:$0xff]  }
  0xcb   :  { %3761 = vmatprep.subr.bf16.mxu1 %v4107_v14  ;;  %v4128_v10 = vld [vmem:[#allocation4 + $0x140] sm:$0xff]  }
  0xcc   :  { %997 = vmatmul.mubr.bf16.vlgmr.msra.gmra.mxu0 %v4637_v4  ;;  %v4093_v4 = vld [vmem:[#allocation4 + $0x98] sm:$0xff]  }
  0xcd   :  { %3740 = vmatpush3.bf16.msra.mxu0 %v4077_v1  ;;  %v4120_v1 = vld [vmem:[#allocation4 + $0x118] sm:$0xff]  }
  0xce   :  { %3741 = vmatprep.subr.bf16.mxu0 %v4080_v2  ;;  %v4122_v2 = vld [vmem:[#allocation4 + $0x150] sm:$0xff]  }
  0xd1   :  { %3742 = vmatpush3.bf16.msra.mxu0 %v4081_v3  ;;  %v4118_v3 = vld [vmem:[#allocation4 + $0x198] sm:$0xff]  }
  0xd2   :  { %3743 = vmatprep.subr.bf16.mxu0 %v4084_v7  ;;  %v4121_v7 = vld [vmem:[#allocation4 + $0x190] sm:$0xff]  }
  0xd5   :  { %3744 = vmatpush3.bf16.msra.mxu0 %v4085_v8  ;;  %v297_v8 = vsub.s32 6, %v4644_v23 }
  0xd6   :  { %3745 = vmatprep.subr.bf16.mxu0 %v4088_v11  ;;  %v4124_v11 = vld [vmem:[#allocation4 + $0x188] sm:$0xff]  }
  0xd9   :  { %3746 = vmatpush3.bf16.msra.mxu0 %v4089_v12 }
  0xda   :  { %3747 = vmatprep.subr.bf16.mxu0 %v4092_v13  ;;  %v298_v13 = vrot.slane %v4652_v25, %v297_v8 }
  0xdd   :  { %3748 = vmatpush3.bf16.msra.mxu0 %v4093_v4  ;;  %v4129_v4 = vld [vmem:[#allocation4 + $0x100] sm:$0xff]  }
  0xde   :  { %3749 = vmatprep.subr.bf16.mxu0 %v4096_v15 }
  0xe1   :  { %3750 = vmatpush3.bf16.msra.mxu0 %v4097_v16  ;;  %v4127_v16 = vld [vmem:[#allocation4 + $0x180] sm:$0xff]  }
  0xe2   :  { %3751 = vmatprep.subr.bf16.mxu0 %v4100_v17 }
  0xe5   :  { %3752 = vmatpush3.bf16.msra.mxu0 %v4101_v18 }
  0xe6   :  { %3753 = vmatprep.subr.bf16.mxu0 %v4104_v19 }
  0xe9   :  { %3754 = vmatpush3.bf16.msra.mxu0 %v4105_v20 }
  0xea   :  { %3819 = vmatprep.subr.bf16.mxu0 %v4534_v21 }
 0x14c   :  { %v916_v32 = vpop.f32.mrf.mxu0  ;;  %v957_v36 = vpop.f32.mrf.mxu1 }
 0x14d   :  { %v917_v33 = vadd.f32 %v916_v32, %v274_v28  ;;  %v958_v38 = vadd.f32 %v957_v36, %v282_v31  ;;  %v289_v28 = vsub.s32 4, %v4644_v23 }
 0x14e   :  { %v918_v35 = vpop.f32.mrf.mxu0  ;;  %v959_v41 = vpop.f32.mrf.mxu1 }
 0x14f   :  { %v919_v37 = vadd.f32 %v918_v35, %v278_v30  ;;  %v1045_v39 = vmax.f32 %v917_v33, 0.0  ;;  %v1047_v43 = vmax.f32 %v958_v38, 0.0  ;;  %v960_v44 = vadd.f32 %v959_v41, %v286_v34 }
 0x150   :  { %v920_v40 = vpop.f32.mrf.mxu0  ;;  %v961_v46 = vpop.f32.mrf.mxu1  ;;  %v293_v30 = vsub.s32 5, %v4644_v23  ;;  %v290_v31 = vrot.slane %v4652_v25, %v289_v28 }
 0x151   :  { %v1046_v42 = vmax.f32 %v919_v37, 0.0  ;;  %v1048_v48 = vmax.f32 %v960_v44, 0.0  ;;  %v1052_v50 = vpack.c.bf16 %v1045_v39, %v1045_v39  ;;  %v1054_v51 = vpack.c.bf16 %v1047_v43, %v1047_v43  ;;  %v4130_v43 = vld [vmem:[#allocation6 + $0x38] sm:$0xff]   ;;  %v4131_v44 = vld [vmem:[#allocation6 + $0x30] sm:$0xff]  }
 0x152   :  { %v921_v45 = vpop.f32.mrf.mxu0  ;;  %v962_v52 = vpop.f32.mrf.mxu1  ;;  %v294_v32 = vrot.slane %v4652_v25, %v293_v30  ;;  %v4132_v25 = vld [vmem:[#allocation6 + $0x28] sm:$0xff]   ;;  %v4134_v46 = vld [vmem:[#allocation6 + $0x18] sm:$0xff]  }
 0x153   :  { %v1053_v47 = vpack.c.bf16 %v1046_v42, %v1046_v42  ;;  %v1055_v54 = vpack.c.bf16 %v1048_v48, %v1048_v48  ;;  %v4133_v45 = vld [vmem:[#allocation6 + $0x20] sm:$0xff]   ;;  %v4136_v48 = vld [vmem:[#allocation6 + $0x8] sm:$0xff]  }
 0x154   :  { %v4140_v52 = vld [vmem:[#allocation7 + $0x28] sm:$0xff]  }
 0x155   :  { %1546 = vmatprep.mubr.bf16.mxu1 %v1053_v47  ;;  %1586 = vmatprep.mubr.bf16.mxu0 %v1055_v54  ;;  %v4135_v47 = vld [vmem:[#allocation6 + $0x10] sm:$0xff]   ;;  %v4142_v54 = vld [vmem:[#allocation7 + $0x18] sm:$0xff]  }
 0x156   :  { %1547 = vmatmul.mubr.bf16.vlgmr.msra.gmra.mxu1 %v1052_v50  ;;  %1587 = vmatmul.mubr.bf16.vlgmr.msra.gmra.mxu0 %v1054_v51  ;;  %v4138_v50 = vld [vmem:[#allocation7 + $0x38] sm:$0xff]   ;;  %v4139_v51 = vld [vmem:[#allocation7 + $0x30] sm:$0xff]  }
 0x157   :  { %3762 = vmatpush3.bf16.msra.mxu1 %v4108_v49  ;;  %3820 = vmatpush3.bf16.msra.mxu0 %v4106_v55  ;;  %v4137_v49 = vld [vmem:[#allocation6] sm:$0xff]   ;;  %v4143_v55 = vld [vmem:[#allocation7 + $0x10] sm:$0xff]  }
 0x158   :  { %3763 = vmatprep.subr.bf16.mxu1 %v4110_v53  ;;  %3835 = vmatprep.mubr.msk.bf16.mxu0 %vm4535_vm0, %v4534_v21  ;;  %v4141_v53 = vld [vmem:[#allocation7 + $0x20] sm:$0xff]  }
 0x159   :  { %3821 = vmatprep.subr.bf16.mxu0 %v4534_v21 }
 0x15b   :  { %3764 = vmatpush3.bf16.msra.mxu1 %v4111_v56  ;;  %3822 = vmatpush3.bf16.msra.mxu0 %v4109_v58 }
 0x15c   :  { %3765 = vmatprep.subr.bf16.mxu1 %v4113_v57  ;;  %3823 = vmatprep.subr.bf16.mxu0 %v4534_v21 }
 0x15f   :  { %3766 = vmatpush3.bf16.msra.mxu1 %v4114_v59  ;;  %3824 = vmatpush3.bf16.msra.mxu0 %v4112_v61 }
 0x160   :  { %3767 = vmatprep.subr.bf16.mxu1 %v4116_v60  ;;  %3825 = vmatprep.subr.bf16.mxu0 %v4534_v21 }
 0x163   :  { %3768 = vmatpush3.bf16.msra.mxu1 %v4117_v62  ;;  %3826 = vmatpush3.bf16.msra.mxu0 %v4115_v0 }
 0x164   :  { %3769 = vmatprep.subr.bf16.mxu1 %v4119_v63  ;;  %3827 = vmatprep.subr.bf16.mxu0 %v4534_v21 }
 0x167   :  { %3770 = vmatpush3.bf16.msra.mxu1 %v4120_v1  ;;  %3828 = vmatpush3.bf16.msra.mxu0 %v4118_v3 }
 0x168   :  { %3771 = vmatprep.subr.bf16.mxu1 %v4122_v2  ;;  %3829 = vmatprep.subr.bf16.mxu0 %v4534_v21 }
 0x16b   :  { %3772 = vmatpush3.bf16.msra.mxu1 %v4123_v5  ;;  %3830 = vmatpush3.bf16.msra.mxu0 %v4121_v7 }
 0x16c   :  { %3773 = vmatprep.subr.bf16.mxu1 %v4125_v6  ;;  %3831 = vmatprep.subr.bf16.mxu0 %v4534_v21  ;;  %v3451_v6 = vld [vmem:[%s4775_s4] ss:$0 sm:$0xff] }
 0x16d   :  { %v3711_v12 = vpop.f32.mrf.mxu1 }
 0x16f   :  { %3774 = vmatpush3.bf16.msra.mxu1 %v4126_v9  ;;  %v3712_v14 = vpop.f32.mrf.mxu1  ;;  %3832 = vmatpush3.bf16.msra.mxu0 %v4124_v11 }
 0x170   :  { %3775 = vmatprep.subr.bf16.mxu1 %v4128_v10  ;;  %v3713_v15 = vadd.f32 %v3712_v14, %v3711_v12  ;;  %3833 = vmatprep.subr.bf16.mxu0 %v4534_v21 }
 0x171   :  { %v3714_v17 = vpop.f32.mrf.mxu1 }
 0x172   :  { %v1040_v18 = vadd.f32 %v3713_v15, %v298_v13 }
 0x173   :  { %3776 = vmatpush3.bf16.msra.mxu1 %v4129_v4  ;;  %v3715_v19 = vpop.f32.mrf.mxu1  ;;  %3834 = vmatpush3.bf16.msra.mxu0 %v4127_v16 }
 0x174   :  { %3839 = vmatprep.subr.bf16.mxu1 %v4534_v21  ;;  %v1051_v20 = vmax.f32 %v1040_v18, 0.0  ;;  %3859 = vmatprep.subr.bf16.mxu0 %v4534_v21  ;;  %v4144_v19 = vld [vmem:[#allocation7 + $0x8] sm:$0xff]  }
 0x176   :  { %v1058_v22 = vpack.c.bf16 %v1051_v20, %v1051_v20  ;;  %v4145_v20 = vld [vmem:[#allocation7] sm:$0xff]  }
 0x178   :  { %3836 = vmatmul.mubr.bf16.vlgmr.msra.gmra.mxu0 %v1058_v22  ;;  %v4146_v22 = vld [vmem:[#allocation9 + $0x188] ss:$28 sps:$4 sm:$0xff]  }
 0x179   :  { %3875 = vmatprep.mubr.msk.bf16.mxu0 %vm4535_vm0, %v4534_v21  ;;  %3860 = vmatpush3.bf16.msra.mxu0 %v4138_v50  ;;  %v4149_v50 = vld [vmem:[#allocation9 + $0x190] ss:$28 sps:$4 sm:$0xff]  }
 0x17a   :  { %3861 = vmatprep.subr.bf16.mxu0 %v4534_v21 }
 0x17d   :  { %3862 = vmatpush3.bf16.msra.mxu0 %v4139_v51 }
 0x17e   :  { %3863 = vmatprep.subr.bf16.mxu0 %v4534_v21 }
 0x181   :  { %3864 = vmatpush3.bf16.msra.mxu0 %v4140_v52  ;;  %v4157_v52 = vld [vmem:[#allocation9 + $0x15c] ss:$28 sps:$4 sm:$0xff]  }
 0x182   :  { %3865 = vmatprep.subr.bf16.mxu0 %v4534_v21 }
 0x185   :  { %3866 = vmatpush3.bf16.msra.mxu0 %v4141_v53 }
 0x186   :  { %3867 = vmatprep.subr.bf16.mxu0 %v4534_v21 }
 0x189   :  { %3868 = vmatpush3.bf16.msra.mxu0 %v4142_v54  ;;  %v4155_v54 = vld [vmem:[#allocation9 + $0x158] ss:$28 sps:$4 sm:$0xff]  }
 0x18a   :  { %3869 = vmatprep.subr.bf16.mxu0 %v4534_v21 }
 0x18c   :  { %v998_v33 = vpop.f32.mrf.mxu0 }
 0x18d   :  { %v999_v34 = vadd.f32 %v998_v33, %v290_v31  ;;  %3870 = vmatpush3.bf16.msra.mxu0 %v4143_v55  ;;  %v4148_v31 = vld [vmem:[#allocation9 + $0x18c] ss:$28 sps:$4 sm:$0xff]   ;;  %v4154_v33 = vld [vmem:[#allocation9 + $0x154] ss:$28 sps:$4 sm:$0xff]   ;;  %v4163_v55 = vld [vmem:[#allocation9 + $0x124] ss:$28 sps:$4 sm:$0xff]  }
 0x18e   :  { %v1000_v35 = vpop.f32.mrf.mxu0  ;;  %3871 = vmatprep.subr.bf16.mxu0 %v4534_v21 }
 0x18f   :  { %v1001_v36 = vadd.f32 %v1000_v35, %v294_v32  ;;  %v1049_v37 = vmax.f32 %v999_v34, 0.0  ;;  %v4151_v32 = vld [vmem:[#allocation9 + $0x194] ss:$28 sps:$4 sm:$0xff]   ;;  %v4160_v35 = vld [vmem:[#allocation9 + $0x11c] ss:$28 sps:$4 sm:$0xff]  }
 0x190   :  { %v1002_v38 = vpop.f32.mrf.mxu0  ;;  %v4152_v34 = vld [vmem:[#allocation9 + $0x150] ss:$28 sps:$4 sm:$0xff]  }
 0x191   :  { %v1050_v39 = vmax.f32 %v1001_v36, 0.0  ;;  %v1056_v42 = vpack.c.bf16 %v1049_v37, %v1049_v37  ;;  %3872 = vmatpush3.bf16.msra.mxu0 %v4144_v19  ;;  %v4158_v36 = vld [vmem:[#allocation9 + $0x118] ss:$28 sps:$4 sm:$0xff]   ;;  %v4166_v37 = vld [vmem:[#allocation9 + $0xe4] ss:$28 sps:$4 sm:$0xff]  }
 0x192   :  { %v1003_v40 = vpop.f32.mrf.mxu0  ;;  %3873 = vmatprep.subr.bf16.mxu0 %v4534_v21  ;;  %v4164_v38 = vld [vmem:[#allocation9 + $0xe0] ss:$28 sps:$4 sm:$0xff]  }
 0x193   :  { %v1057_v41 = vpack.c.bf16 %v1050_v39, %v1050_v39  ;;  %v4172_v39 = vld [vmem:[#allocation9 + $0xac] ss:$28 sps:$4 sm:$0xff]   ;;  %v4198_v19 = vld [vmem:[#allocation9 + $0x160] ss:$28 sps:$4 sm:$0xff]  }
 0x194   :  { %v4170_v40 = vld [vmem:[#allocation9 + $0xa8] ss:$28 sps:$4 sm:$0xff]  }
 0x195   :  { %1626 = vmatprep.mubr.bf16.mxu1 %v1057_v41  ;;  %3874 = vmatpush3.bf16.msra.mxu0 %v4145_v20  ;;  %v4178_v41 = vld [vmem:[#allocation9 + $0x74] ss:$28 sps:$4 sm:$0xff]   ;;  %v4201_v20 = vld [vmem:[#allocation9 + $0x168] ss:$28 sps:$4 sm:$0xff]  }
 0x196   :  { %1627 = vmatmul.mubr.bf16.vlgmr.msra.gmra.mxu1 %v1056_v42  ;;  %2332 = vmatprep.subr.bf16.mxu0 %v4151_v32  ;;  %v4176_v42 = vld [vmem:[#allocation9 + $0x70] ss:$28 sps:$4 sm:$0xff]  }
 0x197   :  { %3855 = vmatprep.mubr.msk.bf16.mxu1 %vm4535_vm0, %v4534_v21  ;;  %3840 = vmatpush3.bf16.msra.mxu1 %v4130_v43  ;;  %v4184_v43 = vld [vmem:[#allocation9 + $0x3c] ss:$28 sps:$4 sm:$0xff]   ;;  %v4205_v32 = vld [vmem:[#allocation9 + $0x130] ss:$28 sps:$4 sm:$0xff]  }
 0x198   :  { %3841 = vmatprep.subr.bf16.mxu1 %v4534_v21 }
 0x19b   :  { %3842 = vmatpush3.bf16.msra.mxu1 %v4131_v44  ;;  %v4182_v44 = vld [vmem:[#allocation9 + $0x38] ss:$28 sps:$4 sm:$0xff]  }
 0x19c   :  { %3843 = vmatprep.subr.bf16.mxu1 %v4534_v21 }
 0x19f   :  { %3844 = vmatpush3.bf16.msra.mxu1 %v4132_v25  ;;  %v3508_v25 = vld [vmem:[%s4777_s6] ss:$0 sm:$0xff] }
 0x1a0   :  { %3845 = vmatprep.subr.bf16.mxu1 %v4534_v21 }
 0x1a3   :  { %3846 = vmatpush3.bf16.msra.mxu1 %v4133_v45 }
 0x1a4   :  { %3847 = vmatprep.subr.bf16.mxu1 %v4534_v21 }
 0x1a7   :  { %3848 = vmatpush3.bf16.msra.mxu1 %v4134_v46 }
 0x1a8   :  { %3849 = vmatprep.subr.bf16.mxu1 %v4534_v21 }
 0x1ab   :  { %3850 = vmatpush3.bf16.msra.mxu1 %v4135_v47 }
 0x1ac   :  { %3851 = vmatprep.subr.bf16.mxu1 %v4534_v21 }
 0x1af   :  { %3852 = vmatpush3.bf16.msra.mxu1 %v4136_v48 }
 0x1b0   :  { %3853 = vmatprep.subr.bf16.mxu1 %v4534_v21 }
 0x1b3   :  { %3854 = vmatpush3.bf16.msra.mxu1 %v4137_v49 }
 0x1b4   :  { %2291 = vmatprep.subr.bf16.mxu1 %v4148_v31  ;;  %v4202_v31 = vld [vmem:[#allocation9 + $0x128] ss:$28 sps:$4 sm:$0xff]  }
 0x216   :  { %v3733_v56 = vpop.f32.mrf.mxu1  ;;  %v3755_v58 = vpop.f32.mrf.mxu0 }
 0x218   :  { %v3734_v57 = vpop.f32.mrf.mxu1  ;;  %v3756_v60 = vpop.f32.mrf.mxu0 }
 0x219   :  { %v3735_v5 = vadd.f32 %v3734_v57, %v3733_v56  ;;  %v3757_v9 = vadd.f32 %v3756_v60, %v3755_v58  ;;  %v4161_v56 = vld [vmem:[#allocation9 + $0x120] ss:$28 sps:$4 sm:$0xff]   ;;  %v4169_v57 = vld [vmem:[#allocation9 + $0xec] ss:$28 sps:$4 sm:$0xff]  }
 0x21a   :  { %v3736_v59 = vpop.f32.mrf.mxu1  ;;  %v3758_v62 = vpop.f32.mrf.mxu0  ;;  %v4167_v58 = vld [vmem:[#allocation9 + $0xe8] ss:$28 sps:$4 sm:$0xff]   ;;  %v4173_v60 = vld [vmem:[#allocation9 + $0xb0] ss:$28 sps:$4 sm:$0xff]  }
 0x21b   :  { %v1549_v7 = vadd.f32 %v3735_v5, %v3451_v6  ;;  %v4175_v59 = vld [vmem:[#allocation9 + $0xb4] ss:$28 sps:$4 sm:$0xff]   ;;  %v4191_v5 = vld [vmem:[#allocation9 + $0x8] ss:$28 sps:$4 sm:$0xff]   ;;  %v4196_v6 = vld [vmem:[#allocation9 + $0x19c] ss:$28 sps:$4 sm:$0xff]  }
 0x21c   :  { %v3737_v61 = vpop.f32.mrf.mxu1  ;;  %v3759_v63 = vpop.f32.mrf.mxu0  ;;  %v4179_v62 = vld [vmem:[#allocation9 + $0x78] ss:$28 sps:$4 sm:$0xff]  }
 0x21d   :  { %v1589_v12 = vadd.f32 %v3757_v9, %v1549_v7  ;;  %v4181_v61 = vld [vmem:[#allocation9 + $0x7c] ss:$28 sps:$4 sm:$0xff]   ;;  %v4187_v63 = vld [vmem:[#allocation9 + $0x44] ss:$28 sps:$4 sm:$0xff]   ;;  %v4536_v7 = vmov 0  }
 0x21e   :  { %v3517_v9 = vld [vmem:[%s4779_s8] ss:$0 sm:$0xff] }
 0x238   :  { %v1668_v0 = vpop.f32.mrf.mxu0 }
 0x23a   :  { %v3837_v1 = vpop.f32.mrf.mxu0 }
 0x23b   :  { %v4190_v1 = vld [vmem:[#allocation9 + $0x4] ss:$28 sps:$4 sm:$0xff]  }
 0x23c   :  { %v1671_v2 = vpop.f32.mrf.mxu0 }
 0x23d   :  { %v4193_v2 = vld [vmem:[#allocation9 + $0xc] ss:$28 sps:$4 sm:$0xff]  }
 0x23e   :  { %v3838_v3 = vpop.f32.mrf.mxu0 }
 0x23f   :  { %v4188_v3 = vld [vmem:[#allocation9] ss:$28 sps:$4 sm:$0xff]  }
 0x256   :  { %v3777_v10 = vpop.f32.mrf.mxu1 }
 0x258   :  { %v3778_v11 = vpop.f32.mrf.mxu1 }
 0x259   :  { %v3779_v13 = vadd.f32 %v3778_v11, %v3777_v10 }
 0x25a   :  { %v3780_v4 = vpop.f32.mrf.mxu1 }
 0x25b   :  { %v1629_v14 = vadd.f32 %v3779_v13, %v1589_v12 }
 0x25c   :  { %v3781_v15 = vpop.f32.mrf.mxu1 }
 0x25d   :  { %v1669_v16 = vadd.f32 %v1668_v0, %v1629_v14  ;;  %v4185_v0 = vld [vmem:[#allocation9 + $0x40] ss:$28 sps:$4 sm:$0xff]   ;;  %v4194_v14 = vld [vmem:[#allocation9 + $0x198] ss:$28 sps:$4 sm:$0xff]  }
 0x25e   :  { %v4197_v15 = vld [vmem:[#allocation9 + $0x1a0] ss:$28 sps:$4 sm:$0xff]  }
 0x25f   :  { %v1674_v17 = vmax.f32 %v1669_v16, 0.0 }
 0x261   :  { %v1675_v18 = vpack.c.bf16 %v1674_v17, %v1674_v17  ;;  %v4200_v17 = vld [vmem:[#allocation9 + $0x164] ss:$28 sps:$4 sm:$0xff]  }
 0x263   :  { %3856 = vmatmul.mubr.bf16.vlgmr.msra.gmra.mxu1 %v1675_v18 }
 0x264   :  { %2292 = vmatpush1.bf16.msra.mxu1 %v4146_v22  ;;  %2323 = vmatprep.mubr.bf16.mxu1 %v4536_v7  ;;  %v4204_v22 = vld [vmem:[#allocation9 + $0x12c] ss:$28 sps:$4 sm:$0xff]  }
 0x265   :  { %2293 = vmatprep.subr.bf16.mxu1 %v4154_v33  ;;  %v4208_v33 = vld [vmem:[#allocation9 + $0xf4] ss:$28 sps:$4 sm:$0xff]  }
 0x268   :  { %2294 = vmatpush1.bf16.msra.mxu1 %v4152_v34  ;;  %v4206_v34 = vld [vmem:[#allocation9 + $0xf0] ss:$28 sps:$4 sm:$0xff]  }
 0x269   :  { %2295 = vmatprep.subr.bf16.mxu1 %v4160_v35  ;;  %v4209_v35 = vld [vmem:[#allocation9 + $0xf8] ss:$28 sps:$4 sm:$0xff]  }
 0x26c   :  { %2296 = vmatpush1.bf16.msra.mxu1 %v4158_v36  ;;  %v4212_v36 = vld [vmem:[#allocation9 + $0xbc] ss:$28 sps:$4 sm:$0xff]  }
 0x26d   :  { %2297 = vmatprep.subr.bf16.mxu1 %v4166_v37  ;;  %v4210_v37 = vld [vmem:[#allocation9 + $0xb8] ss:$28 sps:$4 sm:$0xff]  }
 0x270   :  { %2298 = vmatpush1.bf16.msra.mxu1 %v4164_v38  ;;  %v4213_v38 = vld [vmem:[#allocation9 + $0xc0] ss:$28 sps:$4 sm:$0xff]  }
 0x271   :  { %2299 = vmatprep.subr.bf16.mxu1 %v4172_v39  ;;  %v4216_v39 = vld [vmem:[#allocation9 + $0x84] ss:$28 sps:$4 sm:$0xff]  }
 0x274   :  { %2300 = vmatpush1.bf16.msra.mxu1 %v4170_v40  ;;  %v4214_v40 = vld [vmem:[#allocation9 + $0x80] ss:$28 sps:$4 sm:$0xff]  }
 0x275   :  { %2301 = vmatprep.subr.bf16.mxu1 %v4178_v41  ;;  %v4217_v41 = vld [vmem:[#allocation9 + $0x88] ss:$28 sps:$4 sm:$0xff]  }
 0x278   :  { %2302 = vmatpush1.bf16.msra.mxu1 %v4176_v42  ;;  %v4220_v42 = vld [vmem:[#allocation9 + $0x4c] ss:$28 sps:$4 sm:$0xff]  }
 0x279   :  { %2303 = vmatprep.subr.bf16.mxu1 %v4184_v43  ;;  %v4218_v43 = vld [vmem:[#allocation9 + $0x48] ss:$28 sps:$4 sm:$0xff]  }
 0x27c   :  { %2304 = vmatpush1.bf16.msra.mxu1 %v4182_v44  ;;  %v4221_v44 = vld [vmem:[#allocation9 + $0x50] ss:$28 sps:$4 sm:$0xff]  }
 0x27d   :  { %2305 = vmatprep.subr.bf16.mxu1 %v4190_v1  ;;  %v4253_v1 = vld [vmem:[#allocation10 + $0x130] ss:$8 sps:$4 sm:$0xff]  }
 0x280   :  { %2306 = vmatpush1.bf16.msra.mxu1 %v4188_v3  ;;  %v4261_v3 = vld [vmem:[#allocation10 + $0x124] ss:$8 sps:$4 sm:$0xff]  }
 0x281   :  { %2373 = vmatprep.subr.bf16.mxu1 %v4196_v6  ;;  %v4259_v6 = vld [vmem:[#allocation10 + $0x120] ss:$8 sps:$4 sm:$0xff]  }
 0x323   :  { %v1781_v45 = vpop.f32.mrf.mxu1 }
 0x324   :  { %v1782_v46 = vadd.f32 %v3508_v25, %v1781_v45  ;;  %v4224_v25 = vld [vmem:[#allocation9 + $0x14] ss:$28 sps:$4 sm:$0xff]  }
 0x325   :  { %v3857_v47 = vpop.f32.mrf.mxu1  ;;  %v4222_v45 = vld [vmem:[#allocation9 + $0x10] ss:$28 sps:$4 sm:$0xff]  }
 0x326   :  { %v1787_v48 = vmax.f32 %v1782_v46, 0.0  ;;  %v4225_v46 = vld [vmem:[#allocation9 + $0x18] ss:$28 sps:$4 sm:$0xff]  }
 0x327   :  { %v1784_v49 = vpop.f32.mrf.mxu1  ;;  %v4228_v47 = vld [vmem:[#allocation10 + $0x74] ss:$8 sps:$4 sm:$0xff]  }
 0x328   :  { %v1788_v51 = vpack.c.bf16 %v1787_v48, %v1787_v48  ;;  %v4231_v48 = vld [vmem:[#allocation10 + $0x174] ss:$8 sps:$4 sm:$0xff]   ;;  %v4226_v49 = vld [vmem:[#allocation10 + $0x70] ss:$8 sps:$4 sm:$0xff]  }
 0x329   :  { %v3858_v53 = vpop.f32.mrf.mxu1 }
 0x32a   :  { %3876 = vmatmul.mubr.bf16.vlgmr.msra.gmra.mxu0 %v1788_v51  ;;  %v4234_v51 = vld [vmem:[#allocation10 + $0x64] ss:$8 sps:$4 sm:$0xff]   ;;  %v4232_v53 = vld [vmem:[#allocation10 + $0x60] ss:$8 sps:$4 sm:$0xff]  }
 0x32b   :  { %2333 = vmatpush1.bf16.msra.mxu0 %v4149_v50  ;;  %2364 = vmatprep.mubr.bf16.mxu0 %v4536_v7  ;;  %v4229_v50 = vld [vmem:[#allocation10 + $0x170] ss:$8 sps:$4 sm:$0xff]  }
 0x32c   :  { %2334 = vmatprep.subr.bf16.mxu0 %v4157_v52  ;;  %v4237_v52 = vld [vmem:[#allocation10 + $0x164] ss:$8 sps:$4 sm:$0xff]  }
 0x32f   :  { %2335 = vmatpush1.bf16.msra.mxu0 %v4155_v54  ;;  %v4235_v54 = vld [vmem:[#allocation10 + $0x160] ss:$8 sps:$4 sm:$0xff]  }
 0x330   :  { %2336 = vmatprep.subr.bf16.mxu0 %v4163_v55  ;;  %v4243_v55 = vld [vmem:[#allocation10 + $0x154] ss:$8 sps:$4 sm:$0xff]  }
 0x333   :  { %2337 = vmatpush1.bf16.msra.mxu0 %v4161_v56  ;;  %v4238_v56 = vld [vmem:[#allocation10 + $0x50] ss:$8 sps:$4 sm:$0xff]  }
 0x334   :  { %2338 = vmatprep.subr.bf16.mxu0 %v4169_v57  ;;  %v4241_v57 = vld [vmem:[#allocation10 + $0x150] ss:$8 sps:$4 sm:$0xff]  }
 0x337   :  { %2339 = vmatpush1.bf16.msra.mxu0 %v4167_v58  ;;  %v4246_v58 = vld [vmem:[#allocation10 + $0x44] ss:$8 sps:$4 sm:$0xff]  }
 0x338   :  { %2340 = vmatprep.subr.bf16.mxu0 %v4175_v59  ;;  %v4249_v59 = vld [vmem:[#allocation10 + $0x144] ss:$8 sps:$4 sm:$0xff]  }
 0x33b   :  { %2341 = vmatpush1.bf16.msra.mxu0 %v4173_v60  ;;  %v4244_v60 = vld [vmem:[#allocation10 + $0x40] ss:$8 sps:$4 sm:$0xff]  }
 0x33c   :  { %2342 = vmatprep.subr.bf16.mxu0 %v4181_v61  ;;  %v4247_v61 = vld [vmem:[#allocation10 + $0x140] ss:$8 sps:$4 sm:$0xff]  }
 0x33f   :  { %2343 = vmatpush1.bf16.msra.mxu0 %v4179_v62  ;;  %v4252_v62 = vld [vmem:[#allocation10 + $0x34] ss:$8 sps:$4 sm:$0xff]  }
 0x340   :  { %2344 = vmatprep.subr.bf16.mxu0 %v4187_v63  ;;  %v4255_v63 = vld [vmem:[#allocation10 + $0x134] ss:$8 sps:$4 sm:$0xff]  }
 0x343   :  { %2345 = vmatpush1.bf16.msra.mxu0 %v4185_v0  ;;  %v4250_v0 = vld [vmem:[#allocation10 + $0x30] ss:$8 sps:$4 sm:$0xff]  }
 0x344   :  { %2346 = vmatprep.subr.bf16.mxu0 %v4193_v2  ;;  %v4258_v2 = vld [vmem:[#allocation10 + $0x24] ss:$8 sps:$4 sm:$0xff]  }
 0x347   :  { %2347 = vmatpush1.bf16.msra.mxu0 %v4191_v5  ;;  %v4256_v5 = vld [vmem:[#allocation10 + $0x20] ss:$8 sps:$4 sm:$0xff]  }
 0x348   :  { %3879 = vmatprep.subr.bf16.mxu0 %v4534_v21 }
 0x3ea   :  { %v1894_v10 = vpop.f32.mrf.mxu0 }
 0x3eb   :  { %v1895_v11 = vadd.f32 %v3517_v9, %v1894_v10  ;;  %v4264_v9 = vld [vmem:[#allocation10 + $0x14] ss:$8 sps:$4 sm:$0xff]  }
 0x3ec   :  { %v3877_v12 = vpop.f32.mrf.mxu0  ;;  %v4267_v10 = vld [vmem:[#allocation10 + $0x114] ss:$8 sps:$4 sm:$0xff]  }
 0x3ed   :  { %v1900_v13 = vmax.f32 %v1895_v11, 0.0  ;;  %v4262_v11 = vld [vmem:[#allocation10 + $0x10] ss:$8 sps:$4 sm:$0xff]  }
 0x3ee   :  { %v1897_v4 = vpop.f32.mrf.mxu0  ;;  %v4265_v12 = vld [vmem:[#allocation10 + $0x110] ss:$8 sps:$4 sm:$0xff]  }
 0x3ef   :  { %v4722_v16 = vpack.c.bf16 %v1900_v13, %v1900_v13  ;;  %v4270_v13 = vld [vmem:[#allocation10 + $0x4] ss:$8 sps:$4 sm:$0xff]  }
 0x3f0   :  { %v3878_v18 = vpop.f32.mrf.mxu0  ;;  %v4273_v4 = vld [vmem:[#allocation10 + $0x104] ss:$8 sps:$4 sm:$0xff]  }
 0x3f1   :  { %2324 = vmatmul.mubr.bf16.vlgmr.msra.gmra.mxu1 %v4722_v16  ;;  %2365 = vmatmul.mubr.bf16.vlgmr.msra.gmra.mxu0 %v4722_v16  ;;  %v4274_v18 = vld [vmem:[#allocation10 + $0xf0] ss:$8 sps:$4 sm:$0xff]  }
 0x3f2   :  { %2374 = vmatpush1.bf16.msra.mxu1 %v4194_v14  ;;  %3880 = vmatpush3.bf16.msra.mxu0 %v4197_v15  ;;  %v4268_v14 = vld [vmem:[#allocation10] ss:$8 sps:$4 sm:$0xff]  }
 0x3f3   :  { %2375 = vmatprep.subr.bf16.mxu1 %v4200_v17  ;;  %3881 = vmatprep.subr.bf16.mxu0 %v4534_v21  ;;  %v4271_v15 = vld [vmem:[#allocation10 + $0x100] ss:$8 sps:$4 sm:$0xff]   ;;  %v4279_v17 = vld [vmem:[#allocation10 + $0x1f4] ss:$8 sps:$4 sm:$0xff]  }
 0x3f4   :  { %2405 = vmatprep.mubr.bf16.mxu1 %v4536_v7  ;;  %3895 = vmatprep.mubr.msk.bf16.mxu0 %vm4535_vm0, %v4534_v21 }
 0x3f6   :  { %2376 = vmatpush1.bf16.msra.mxu1 %v4198_v19  ;;  %3882 = vmatpush3.bf16.msra.mxu0 %v4201_v20  ;;  %v4277_v19 = vld [vmem:[#allocation10 + $0x1f0] ss:$8 sps:$4 sm:$0xff]   ;;  %v4282_v20 = vld [vmem:[#allocation10 + $0xe4] ss:$8 sps:$4 sm:$0xff]  }
 0x3f7   :  { %2377 = vmatprep.subr.bf16.mxu1 %v4204_v22  ;;  %3883 = vmatprep.subr.bf16.mxu0 %v4534_v21  ;;  %v4285_v22 = vld [vmem:[#allocation10 + $0x1e4] ss:$8 sps:$4 sm:$0xff]  }
 0x3fa   :  { %2378 = vmatpush1.bf16.msra.mxu1 %v4202_v31  ;;  %3884 = vmatpush3.bf16.msra.mxu0 %v4205_v32  ;;  %v4280_v31 = vld [vmem:[#allocation10 + $0xe0] ss:$8 sps:$4 sm:$0xff]  }
 0x3fb   :  { %2379 = vmatprep.subr.bf16.mxu1 %v4208_v33  ;;  %3885 = vmatprep.subr.bf16.mxu0 %v4534_v21  ;;  %v4283_v32 = vld [vmem:[#allocation10 + $0x1e0] ss:$8 sps:$4 sm:$0xff]   ;;  %v4288_v33 = vld [vmem:[#allocation10 + $0xd4] ss:$8 sps:$4 sm:$0xff]  }
 0x3fe   :  { %2380 = vmatpush1.bf16.msra.mxu1 %v4206_v34  ;;  %3886 = vmatpush3.bf16.msra.mxu0 %v4209_v35  ;;  %v4291_v34 = vld [vmem:[#allocation10 + $0x1d4] ss:$8 sps:$4 sm:$0xff]   ;;  %v4286_v35 = vld [vmem:[#allocation10 + $0xd0] ss:$8 sps:$4 sm:$0xff]  }
 0x3ff   :  { %2381 = vmatprep.subr.bf16.mxu1 %v4212_v36  ;;  %3887 = vmatprep.subr.bf16.mxu0 %v4534_v21  ;;  %v4289_v36 = vld [vmem:[#allocation10 + $0x1d0] ss:$8 sps:$4 sm:$0xff]  }
 0x402   :  { %2382 = vmatpush1.bf16.msra.mxu1 %v4210_v37  ;;  %3888 = vmatpush3.bf16.msra.mxu0 %v4213_v38  ;;  %v4294_v37 = vld [vmem:[#allocation10 + $0xc4] ss:$8 sps:$4 sm:$0xff]  }
 0x403   :  { %2383 = vmatprep.subr.bf16.mxu1 %v4216_v39  ;;  %3889 = vmatprep.subr.bf16.mxu0 %v4534_v21  ;;  %v4297_v38 = vld [vmem:[#allocation10 + $0x1c4] ss:$8 sps:$4 sm:$0xff]   ;;  %v4292_v39 = vld [vmem:[#allocation10 + $0xc0] ss:$8 sps:$4 sm:$0xff]  }
 0x406   :  { %2384 = vmatpush1.bf16.msra.mxu1 %v4214_v40  ;;  %3890 = vmatpush3.bf16.msra.mxu0 %v4217_v41  ;;  %v4295_v40 = vld [vmem:[#allocation10 + $0x1c0] ss:$8 sps:$4 sm:$0xff]   ;;  %v4300_v41 = vld [vmem:[#allocation10 + $0xb4] ss:$8 sps:$4 sm:$0xff]  }
 0x407   :  { %2385 = vmatprep.subr.bf16.mxu1 %v4220_v42  ;;  %3891 = vmatprep.subr.bf16.mxu0 %v4534_v21  ;;  %v4303_v42 = vld [vmem:[#allocation10 + $0x1b4] ss:$8 sps:$4 sm:$0xff]  }
 0x40a   :  { %2386 = vmatpush1.bf16.msra.mxu1 %v4218_v43  ;;  %3892 = vmatpush3.bf16.msra.mxu0 %v4221_v44  ;;  %v4298_v43 = vld [vmem:[#allocation10 + $0xb0] ss:$8 sps:$4 sm:$0xff]  }
 0x40b   :  { %2387 = vmatprep.subr.bf16.mxu1 %v4224_v25  ;;  %3893 = vmatprep.subr.bf16.mxu0 %v4534_v21  ;;  %v4240_v21 = vld [vmem:[#allocation10 + $0x54] ss:$8 sps:$4 sm:$0xff]   ;;  %v4301_v44 = vld [vmem:[#allocation10 + $0x1b0] ss:$8 sps:$4 sm:$0xff]   ;;  %v4306_v25 = vld [vmem:[#allocation10 + $0xa4] ss:$8 sps:$4 sm:$0xff]  }
 0x40e   :  { %2388 = vmatpush1.bf16.msra.mxu1 %v4222_v45  ;;  %3894 = vmatpush3.bf16.msra.mxu0 %v4225_v46  ;;  %v4309_v45 = vld [vmem:[#allocation10 + $0x1a4] ss:$8 sps:$4 sm:$0xff]   ;;  %v4304_v46 = vld [vmem:[#allocation10 + $0xa0] ss:$8 sps:$4 sm:$0xff]  }
 0x40f   :  { %3152 = vmatprep.subr.bf16.mxu1 %v4228_v47  ;;  %3193 = vmatprep.subr.bf16.mxu0 %v4231_v48  ;;  %v4307_v47 = vld [vmem:[#allocation10 + $0x1a0] ss:$8 sps:$4 sm:$0xff]   ;;  %v4312_v48 = vld [vmem:[#allocation10 + $0x94] ss:$8 sps:$4 sm:$0xff]  }
 0x411   :  { %2406 = vmatmul.mubr.bf16.vlgmr.msra.gmra.mxu1 %v4722_v16  ;;  %3896 = vmatmul.mubr.bf16.vlgmr.msra.gmra.mxu0 %v4722_v16  ;;  %v4276_v16 = vld [vmem:[#allocation10 + $0xf4] ss:$8 sps:$4 sm:$0xff]  }
 0x412   :  { %3153 = vmatpush1.bf16.msra.mxu1 %v4226_v49  ;;  %3194 = vmatpush1.bf16.msra.mxu0 %v4229_v50  ;;  %v4315_v49 = vld [vmem:[#allocation10 + $0x194] ss:$8 sps:$4 sm:$0xff]   ;;  %v4310_v50 = vld [vmem:[#allocation10 + $0x90] ss:$8 sps:$4 sm:$0xff]  }
 0x413   :  { %3154 = vmatprep.subr.bf16.mxu1 %v4234_v51  ;;  %3195 = vmatprep.subr.bf16.mxu0 %v4237_v52  ;;  %v4313_v51 = vld [vmem:[#allocation10 + $0x190] ss:$8 sps:$4 sm:$0xff]   ;;  %v4318_v52 = vld [vmem:[#allocation10 + $0x84] ss:$8 sps:$4 sm:$0xff]  }
 0x416   :  { %3155 = vmatpush1.bf16.msra.mxu1 %v4232_v53  ;;  %3196 = vmatpush1.bf16.msra.mxu0 %v4235_v54  ;;  %v4321_v53 = vld [vmem:[#allocation10 + $0x184] ss:$8 sps:$4 sm:$0xff]   ;;  %v4316_v54 = vld [vmem:[#allocation10 + $0x80] ss:$8 sps:$4 sm:$0xff]  }
 0x417   :  { %3156 = vmatprep.subr.bf16.mxu1 %v4240_v21  ;;  %3197 = vmatprep.subr.bf16.mxu0 %v4243_v55  ;;  %v4319_v21 = vld [vmem:[#allocation10 + $0x180] ss:$8 sps:$4 sm:$0xff]   ;;  %v4324_v55 = vld [vmem:[#allocation10 + $0x274] ss:$8 sps:$4 sm:$0xff]  }
 0x41a   :  { %3157 = vmatpush1.bf16.msra.mxu1 %v4238_v56  ;;  %3198 = vmatpush1.bf16.msra.mxu0 %v4241_v57  ;;  %v4327_v56 = vld [vmem:[#allocation10 + $0x374] ss:$8 sps:$4 sm:$0xff]   ;;  %v4741_v57 = vld [vmem:[%s4781_s10] sm:$0xff] }
 0x41b   :  { %3158 = vmatprep.subr.bf16.mxu1 %v4246_v58  ;;  %3199 = vmatprep.subr.bf16.mxu0 %v4249_v59  ;;  %v1971_v58 = vrot.slane %v4741_v57, %v4647_v24  ;;  %v1979_v59 = vrot.slane %v4741_v57, %v281_v27 }
 0x41e   :  { %3159 = vmatpush1.bf16.msra.mxu1 %v4244_v60  ;;  %3200 = vmatpush1.bf16.msra.mxu0 %v4247_v61  ;;  %v1975_v60 = vrot.slane %v4741_v57, %v4655_v26  ;;  %v1983_v61 = vrot.slane %v4741_v57, %v285_v29  ;;  %v4325_v29 = vld [vmem:[#allocation10 + $0x370] ss:$8 sps:$4 sm:$0xff]  }
 0x41f   :  { %3160 = vmatprep.subr.bf16.mxu1 %v4252_v62  ;;  %3201 = vmatprep.subr.bf16.mxu0 %v4255_v63 }
 0x422   :  { %3161 = vmatpush1.bf16.msra.mxu1 %v4250_v0  ;;  %3202 = vmatpush1.bf16.msra.mxu0 %v4253_v1 }
 0x423   :  { %3162 = vmatprep.subr.bf16.mxu1 %v4258_v2  ;;  %3203 = vmatprep.subr.bf16.mxu0 %v4261_v3 }
 0x426   :  { %3163 = vmatpush1.bf16.msra.mxu1 %v4256_v5  ;;  %3204 = vmatpush1.bf16.msra.mxu0 %v4259_v6 }
 0x427   :  { %3164 = vmatprep.subr.bf16.mxu1 %v4264_v9  ;;  %3205 = vmatprep.subr.bf16.mxu0 %v4267_v10 }
 0x42a   :  { %3165 = vmatpush1.bf16.msra.mxu1 %v4262_v11  ;;  %3206 = vmatpush1.bf16.msra.mxu0 %v4265_v12 }
 0x42b   :  { %3166 = vmatprep.subr.bf16.mxu1 %v4270_v13  ;;  %3207 = vmatprep.subr.bf16.mxu0 %v4273_v4 }
 0x42e   :  { %3167 = vmatpush1.bf16.msra.mxu1 %v4268_v14  ;;  %3208 = vmatpush1.bf16.msra.mxu0 %v4271_v15 }
 0x42f   :  { %3168 = vmatprep.subr.bf16.mxu1 %v4276_v16  ;;  %3209 = vmatprep.subr.bf16.mxu0 %v4279_v17  ;;  %v4322_v17 = vld [vmem:[#allocation10 + $0x270] ss:$8 sps:$4 sm:$0xff]  }
 0x432   :  { %3169 = vmatpush2.bf16.msra.mxu1 %v4274_v18  ;;  %3210 = vmatpush2.bf16.msra.mxu0 %v4277_v19 }
 0x433   :  { %3170 = vmatprep.subr.bf16.mxu1 %v4282_v20  ;;  %3211 = vmatprep.subr.bf16.mxu0 %v4285_v22  ;;  %v4330_v20 = vld [vmem:[#allocation10 + $0x264] ss:$8 sps:$4 sm:$0xff]  }
 0x434   :  { %v4333_v22 = vld [vmem:[#allocation10 + $0x364] ss:$8 sps:$4 sm:$0xff]  }
 0x436   :  { %3171 = vmatpush2.bf16.msra.mxu1 %v4280_v31  ;;  %3212 = vmatpush2.bf16.msra.mxu0 %v4283_v32  ;;  %v4328_v31 = vld [vmem:[#allocation10 + $0x260] ss:$8 sps:$4 sm:$0xff]  }
 0x437   :  { %3172 = vmatprep.subr.bf16.mxu1 %v4288_v33  ;;  %3213 = vmatprep.subr.bf16.mxu0 %v4291_v34  ;;  %v4331_v32 = vld [vmem:[#allocation10 + $0x360] ss:$8 sps:$4 sm:$0xff]   ;;  %v4336_v33 = vld [vmem:[#allocation10 + $0x254] ss:$8 sps:$4 sm:$0xff]  }
 0x438   :  { %v4339_v34 = vld [vmem:[#allocation10 + $0x354] ss:$8 sps:$4 sm:$0xff]  }
 0x43a   :  { %3173 = vmatpush2.bf16.msra.mxu1 %v4286_v35  ;;  %3214 = vmatpush2.bf16.msra.mxu0 %v4289_v36  ;;  %v4334_v35 = vld [vmem:[#allocation10 + $0x250] ss:$8 sps:$4 sm:$0xff]  }
 0x43b   :  { %3174 = vmatprep.subr.bf16.mxu1 %v4294_v37  ;;  %3215 = vmatprep.subr.bf16.mxu0 %v4297_v38  ;;  %v4337_v36 = vld [vmem:[#allocation10 + $0x350] ss:$8 sps:$4 sm:$0xff]   ;;  %v4342_v37 = vld [vmem:[#allocation10 + $0x244] ss:$8 sps:$4 sm:$0xff]  }
 0x43c   :  { %v4345_v38 = vld [vmem:[#allocation10 + $0x344] ss:$8 sps:$4 sm:$0xff]  }
 0x43e   :  { %3175 = vmatpush2.bf16.msra.mxu1 %v4292_v39  ;;  %3216 = vmatpush2.bf16.msra.mxu0 %v4295_v40  ;;  %v4340_v39 = vld [vmem:[#allocation10 + $0x240] ss:$8 sps:$4 sm:$0xff]  }
 0x43f   :  { %3176 = vmatprep.subr.bf16.mxu1 %v4300_v41  ;;  %3217 = vmatprep.subr.bf16.mxu0 %v4303_v42  ;;  %v4343_v40 = vld [vmem:[#allocation10 + $0x340] ss:$8 sps:$4 sm:$0xff]   ;;  %v4348_v41 = vld [vmem:[#allocation10 + $0x234] ss:$8 sps:$4 sm:$0xff]  }
 0x440   :  { %v4351_v42 = vld [vmem:[#allocation10 + $0x334] ss:$8 sps:$4 sm:$0xff]  }
 0x442   :  { %3177 = vmatpush2.bf16.msra.mxu1 %v4298_v43  ;;  %3218 = vmatpush2.bf16.msra.mxu0 %v4301_v44  ;;  %v4346_v43 = vld [vmem:[#allocation10 + $0x230] ss:$8 sps:$4 sm:$0xff]   ;;  %v4354_v44 = vld [vmem:[#allocation10 + $0x224] ss:$8 sps:$4 sm:$0xff]  }
 0x443   :  { %3178 = vmatprep.subr.bf16.mxu1 %v4306_v25  ;;  %3219 = vmatprep.subr.bf16.mxu0 %v4309_v45  ;;  %v4357_v25 = vld [vmem:[#allocation10 + $0x324] ss:$8 sps:$4 sm:$0xff]   ;;  %v4352_v45 = vld [vmem:[#allocation10 + $0x220] ss:$8 sps:$4 sm:$0xff]  }
 0x446   :  { %3179 = vmatpush2.bf16.msra.mxu1 %v4304_v46  ;;  %3220 = vmatpush2.bf16.msra.mxu0 %v4307_v47  ;;  %v4355_v46 = vld [vmem:[#allocation10 + $0x320] ss:$8 sps:$4 sm:$0xff]   ;;  %v4360_v47 = vld [vmem:[#allocation10 + $0x214] ss:$8 sps:$4 sm:$0xff]  }
 0x447   :  { %3180 = vmatprep.subr.bf16.mxu1 %v4312_v48  ;;  %3221 = vmatprep.subr.bf16.mxu0 %v4315_v49  ;;  %v4363_v48 = vld [vmem:[#allocation10 + $0x314] ss:$8 sps:$4 sm:$0xff]   ;;  %v1995_v49 = vrot.slane %v4741_v57, %v297_v8  ;;  %v4364_v8 = vld [vmem:[#allocation10 + $0x200] ss:$8 sps:$4 sm:$0xff]  }
 0x44a   :  { %3181 = vmatpush2.bf16.msra.mxu1 %v4310_v50  ;;  %3222 = vmatpush2.bf16.msra.mxu0 %v4313_v51  ;;  %v1991_v50 = vrot.slane %v4741_v57, %v293_v30  ;;  %v4358_v51 = vld [vmem:[#allocation10 + $0x210] ss:$8 sps:$4 sm:$0xff]   ;;  %v4372_v30 = vld [vmem:[#allocation10 + $0x2f4] ss:$8 sps:$4 sm:$0xff]  }
 0x44b   :  { %3182 = vmatprep.subr.bf16.mxu1 %v4318_v52  ;;  %3223 = vmatprep.subr.bf16.mxu0 %v4321_v53  ;;  %v4361_v52 = vld [vmem:[#allocation10 + $0x310] ss:$8 sps:$4 sm:$0xff]  }
 0x44e   :  { %3183 = vmatpush2.bf16.msra.mxu1 %v4316_v54  ;;  %3224 = vmatpush2.bf16.msra.mxu0 %v4319_v21  ;;  %v4366_v21 = vld [vmem:[#allocation10 + $0x204] ss:$8 sps:$4 sm:$0xff]  }
 0x44f   :  { %3234 = vmatprep.subr.bf16.mxu1 %v4324_v55  ;;  %3275 = vmatprep.subr.bf16.mxu0 %v4327_v56  ;;  %v4369_v55 = vld [vmem:[#allocation10 + $0x304] ss:$8 sps:$4 sm:$0xff]  }
 0x4b1   :  { %v2325_v62 = vpop.f32.mrf.mxu1  ;;  %v2366_v63 = vpop.f32.mrf.mxu0 }
 0x4b2   :  { %v2326_v0 = vadd.f32 %v2325_v62, %v1971_v58  ;;  %v2367_v1 = vadd.f32 %v2366_v63, %v1979_v59 }
 0x4b3   :  { %v2327_v2 = vpop.f32.mrf.mxu1  ;;  %v2368_v3 = vpop.f32.mrf.mxu0 }
 0x4b4   :  { %v2328_v5 = vadd.f32 %v2327_v2, %v1975_v60  ;;  %v2369_v6 = vadd.f32 %v2368_v3, %v1983_v61  ;;  %v2454_v9 = vmax.f32 %v2326_v0, 0.0  ;;  %v2456_v10 = vmax.f32 %v2367_v1, 0.0  ;;  %v4367_v61 = vld [vmem:[#allocation10 + $0x300] ss:$8 sps:$4 sm:$0xff]  }
 0x4b5   :  { %v2329_v11 = vpop.f32.mrf.mxu1  ;;  %v2370_v12 = vpop.f32.mrf.mxu0 }
 0x4b6   :  { %v2455_v27 = vmax.f32 %v2328_v5, 0.0  ;;  %v2457_v13 = vmax.f32 %v2369_v6, 0.0  ;;  %v2461_v18 = vpack.c.bf16 %v2454_v9, %v2454_v9  ;;  %v2463_v19 = vpack.c.bf16 %v2456_v10, %v2456_v10  ;;  %v4370_v6 = vld [vmem:[#allocation10 + $0x2f0] ss:$8 sps:$4 sm:$0xff]   ;;  %v4375_v10 = vld [vmem:[#allocation10 + $0x2e4] ss:$8 sps:$4 sm:$0xff]  }
 0x4b7   :  { %v2330_v4 = vpop.f32.mrf.mxu1  ;;  %v2371_v14 = vpop.f32.mrf.mxu0  ;;  %v4373_v11 = vld [vmem:[#allocation10 + $0x2e0] ss:$8 sps:$4 sm:$0xff]   ;;  %v4378_v12 = vld [vmem:[#allocation10 + $0x2d4] ss:$8 sps:$4 sm:$0xff]  }
 0x4b8   :  { %v2462_v15 = vpack.c.bf16 %v2455_v27, %v2455_v27  ;;  %v2464_v16 = vpack.c.bf16 %v2457_v13, %v2457_v13  ;;  %v4376_v27 = vld [vmem:[#allocation10 + $0x2d0] ss:$8 sps:$4 sm:$0xff]   ;;  %v4381_v13 = vld [vmem:[#allocation10 + $0x2c4] ss:$8 sps:$4 sm:$0xff]   ;;  %v4379_v4 = vld [vmem:[#allocation10 + $0x2c0] ss:$8 sps:$4 sm:$0xff]  }
 0x4b9   :  { %v4384_v14 = vld [vmem:[#allocation10 + $0x2b4] ss:$8 sps:$4 sm:$0xff]  }
 0x4ba   :  { %3184 = vmatprep.mubr.bf16.mxu1 %v2462_v15  ;;  %3225 = vmatprep.mubr.bf16.mxu0 %v2464_v16  ;;  %v4382_v15 = vld [vmem:[#allocation10 + $0x2b0] ss:$8 sps:$4 sm:$0xff]   ;;  %v4387_v16 = vld [vmem:[#allocation10 + $0x2a4] ss:$8 sps:$4 sm:$0xff]  }
 0x4bb   :  { %3185 = vmatmul.mubr.bf16.vlgmr.msra.gmra.mxu1 %v2461_v18  ;;  %3226 = vmatmul.mubr.bf16.vlgmr.msra.gmra.mxu0 %v2463_v19  ;;  %v4390_v18 = vld [vmem:[#allocation10 + $0x294] ss:$8 sps:$4 sm:$0xff]   ;;  %v4388_v19 = vld [vmem:[#allocation10 + $0x290] ss:$8 sps:$4 sm:$0xff]  }
 0x4bc   :  { %3235 = vmatpush1.bf16.msra.mxu1 %v4322_v17  ;;  %3276 = vmatpush1.bf16.msra.mxu0 %v4325_v29  ;;  %v4385_v17 = vld [vmem:[#allocation10 + $0x2a0] ss:$8 sps:$4 sm:$0xff]   ;;  %v1987_v29 = vrot.slane %v4741_v57, %v289_v28 }
 0x4bd   :  { %3236 = vmatprep.subr.bf16.mxu1 %v4330_v20  ;;  %3277 = vmatprep.subr.bf16.mxu0 %v4333_v22  ;;  %v4393_v22 = vld [vmem:[#allocation10 + $0x284] ss:$8 sps:$4 sm:$0xff]  }
 0x4be   :  { %3307 = vmatprep.mubr.bf16.mxu0 %v4536_v7  ;;  %v4349_v7 = vld [vmem:[#allocation10 + $0x330] ss:$8 sps:$4 sm:$0xff]  }
 0x4c0   :  { %3237 = vmatpush1.bf16.msra.mxu1 %v4328_v31  ;;  %3278 = vmatpush1.bf16.msra.mxu0 %v4331_v32  ;;  %v4391_v31 = vld [vmem:[#allocation10 + $0x280] ss:$8 sps:$4 sm:$0xff]  }
 0x4c1   :  { %3238 = vmatprep.subr.bf16.mxu1 %v4336_v33  ;;  %3279 = vmatprep.subr.bf16.mxu0 %v4339_v34 }
 0x4c4   :  { %3239 = vmatpush1.bf16.msra.mxu1 %v4334_v35  ;;  %3280 = vmatpush1.bf16.msra.mxu0 %v4337_v36 }
 0x4c5   :  { %3240 = vmatprep.subr.bf16.mxu1 %v4342_v37  ;;  %3281 = vmatprep.subr.bf16.mxu0 %v4345_v38 }
 0x4c8   :  { %3241 = vmatpush1.bf16.msra.mxu1 %v4340_v39  ;;  %3282 = vmatpush1.bf16.msra.mxu0 %v4343_v40 }
 0x4c9   :  { %3242 = vmatprep.subr.bf16.mxu1 %v4348_v41  ;;  %3283 = vmatprep.subr.bf16.mxu0 %v4351_v42 }
 0x4cc   :  { %3243 = vmatpush1.bf16.msra.mxu1 %v4346_v43  ;;  %3284 = vmatpush1.bf16.msra.mxu0 %v4349_v7  ;;  %v2580_v43 = vld [vmem:[%s4783_s12] sm:$0x3] }
 0x4cd   :  { %3244 = vmatprep.subr.bf16.mxu1 %v4354_v44  ;;  %3285 = vmatprep.subr.bf16.mxu0 %v4357_v25  ;;  %v2585_v7 = vrot.slane %v2580_v43, %v4647_v24  ;;  %v2589_v44 = vrot.slane %v2580_v43, %v4655_v26 }
 0x4d0   :  { %3245 = vmatpush1.bf16.msra.mxu1 %v4352_v45  ;;  %3286 = vmatpush1.bf16.msra.mxu0 %v4355_v46 }
 0x4d1   :  { %v2407_v53 = vpop.f32.mrf.mxu1  ;;  %v2448_v54 = vpop.f32.mrf.mxu0  ;;  %3246 = vmatprep.subr.bf16.mxu1 %v4360_v47  ;;  %3287 = vmatprep.subr.bf16.mxu0 %v4363_v48 }
 0x4d2   :  { %v2449_v56 = vadd.f32 %v2448_v54, %v1995_v49  ;;  %v2408_v20 = vadd.f32 %v2407_v53, %v1987_v29 }
 0x4d3   :  { %v2409_v58 = vpop.f32.mrf.mxu1  ;;  %v3897_v59 = vpop.f32.mrf.mxu0 }
 0x4d4   :  { %v2410_v60 = vadd.f32 %v2409_v58, %v1991_v50  ;;  %3247 = vmatpush1.bf16.msra.mxu1 %v4358_v51  ;;  %3288 = vmatpush1.bf16.msra.mxu0 %v4361_v52  ;;  %v2460_v62 = vmax.f32 %v2449_v56, 0.0  ;;  %v2458_v32 = vmax.f32 %v2408_v20, 0.0 }
 0x4d5   :  { %v2411_v63 = vpop.f32.mrf.mxu1  ;;  %v2451_v0 = vpop.f32.mrf.mxu0  ;;  %3248 = vmatprep.subr.bf16.mxu1 %v4366_v21  ;;  %3289 = vmatprep.subr.bf16.mxu0 %v4369_v55 }
 0x4d6   :  { %v2459_v1 = vmax.f32 %v2410_v60, 0.0  ;;  %v2467_v9 = vpack.c.bf16 %v2460_v62, %v2460_v62  ;;  %v2465_v33 = vpack.c.bf16 %v2458_v32, %v2458_v32 }
 0x4d7   :  { %v2412_v2 = vpop.f32.mrf.mxu1  ;;  %v3898_v3 = vpop.f32.mrf.mxu0 }
 0x4d8   :  { %v2466_v5 = vpack.c.bf16 %v2459_v1, %v2459_v1  ;;  %3249 = vmatpush1.bf16.msra.mxu1 %v4364_v8  ;;  %3290 = vmatpush1.bf16.msra.mxu0 %v4367_v61 }
 0x4d9   :  { %3250 = vmatprep.subr.bf16.mxu1 %v4372_v30 }
 0x4da   :  { %3266 = vmatprep.mubr.bf16.mxu1 %v2466_v5 }
 0x4db   :  { %3308 = vmatmul.mubr.bf16.vlgmr.msra.gmra.mxu0 %v2467_v9 }
 0x4dc   :  { %3251 = vmatpush2.bf16.msra.mxu1 %v4370_v6 }
 0x4dd   :  { %3252 = vmatprep.subr.bf16.mxu1 %v4375_v10 }
 0x4e0   :  { %3253 = vmatpush2.bf16.msra.mxu1 %v4373_v11 }
 0x4e1   :  { %3254 = vmatprep.subr.bf16.mxu1 %v4378_v12 }
 0x4e4   :  { %3255 = vmatpush2.bf16.msra.mxu1 %v4376_v27 }
 0x4e5   :  { %3256 = vmatprep.subr.bf16.mxu1 %v4381_v13 }
 0x4e8   :  { %3257 = vmatpush2.bf16.msra.mxu1 %v4379_v4 }
 0x4e9   :  { %3258 = vmatprep.subr.bf16.mxu1 %v4384_v14 }
 0x4ec   :  { %3259 = vmatpush2.bf16.msra.mxu1 %v4382_v15 }
 0x4ed   :  { %3260 = vmatprep.subr.bf16.mxu1 %v4387_v16 }
 0x4f0   :  { %3261 = vmatpush2.bf16.msra.mxu1 %v4385_v17 }
 0x4f1   :  { %3262 = vmatprep.subr.bf16.mxu1 %v4390_v18 }
 0x4f4   :  { %3263 = vmatpush2.bf16.msra.mxu1 %v4388_v19 }
 0x4f5   :  { %3264 = vmatprep.subr.bf16.mxu1 %v4393_v22 }
 0x4f8   :  { %3265 = vmatpush2.bf16.msra.mxu1 %v4391_v31 }
 0x4fb   :  { %3267 = vmatmul.mubr.bf16.vlgmr.msra.gmra.mxu1 %v2465_v33 }
 0x57b   :  { %v3186_v34 = vpop.f32.mrf.mxu1  ;;  %v3227_v35 = vpop.f32.mrf.mxu0 }
 0x57c   :  { %v3187_v25 = vadd.f32 %v3186_v34, %v2585_v7 }
 0x57d   :  { %v3188_v36 = vpop.f32.mrf.mxu1  ;;  %v3229_v23 = vpop.f32.mrf.mxu0 }
 0x57e   :  { %v3189_v45 = vadd.f32 %v3188_v36, %v2589_v44  ;;  %v3228_v46 = vadd.f32 %v3227_v35, %v3187_v25 }
 0x57f   :  { %v3190_v37 = vpop.f32.mrf.mxu1  ;;  %v3231_v28 = vpop.f32.mrf.mxu0 }
 0x580   :  { %v3230_v48 = vadd.f32 %v3229_v23, %v3189_v45 }
 0x581   :  { %v3191_v57 = vpop.f32.mrf.mxu1  ;;  %v3232_v38 = vpop.f32.mrf.mxu0 }
 0x59b   :  { %v3309_v39 = vpop.f32.mrf.mxu0 }
 0x59d   :  { %v3311_v40 = vpop.f32.mrf.mxu0 }
 0x59f   :  { %v3313_v41 = vpop.f32.mrf.mxu0 }
 0x5a1   :  { %v3314_v42 = vpop.f32.mrf.mxu0 }
 0x5bb   :  { %v3268_v47 = vpop.f32.mrf.mxu1 }
 0x5bc   :  { %v3269_v49 = vadd.f32 %v3268_v47, %v3228_v46 }
 0x5bd   :  { %v3270_v50 = vpop.f32.mrf.mxu1 }
 0x5be   :  { %v3310_v51 = vadd.f32 %v3309_v39, %v3269_v49  ;;  %v3271_v52 = vadd.f32 %v3270_v50, %v3230_v48 }
 0x5bf   :  { %v3272_v53 = vpop.f32.mrf.mxu1 }
 0x5c0   :  { %v3312_v54 = vadd.f32 %v3311_v40, %v3271_v52  ;;  %v3316_v55 = vmax.f32 %v3310_v51, 0.0 }
 0x5c1   :  { %v3273_v21 = vpop.f32.mrf.mxu1 }
 0x5c2   :  { %v3317_v56 = vmax.f32 %v3312_v54, 0.0 }
 0x5c4   :  { %v3320_v58 = vcombine.low %v3316_v55, %v3317_v56 }
 0x5c6   :  { %3694 = vst.sshfl [vmem:[%s4784_s13] sm:$0x33 pattern:$0x76325410] %v3320_v58 }
 0x5c7   :  { %3334 = vsyncpa [#allocation3], 1 }
 0x5c8   :  { %3335 = vsyncpa [#allocation5], 1 }
 0x5c9   :  { %3336 = vsyncpa [#allocation8], 1 }
 0x5ca   :  { %3337 = vsyncpa [#allocation11], 1 }

</bundles_post_ra>
